<compile_context>
chip_gen: v7x
topology: tpu7x:2x2x1
jax: 0.10.0
libtpu: 0.0.40
codegen_flags: <defaults>
</compile_context>

<pallas_src>
import functools

import jax
import jax.numpy as jnp
from jax.experimental import pallas as pl
from jax.experimental.pallas import tpu as pltpu

BN_EPS = 1e-5
LANES = 128


def _round_up(x, m):
    return (x + m - 1) // m * m


def _pick_block_rows(H, W, target_rows):
    # Even row-tile height, >= 2, <= round_up(H, 2), ~target_rows/W output rows
    # per tile.  th does NOT have to divide H (tail rows are masked in-kernel).
    th = (max(1, target_rows // max(W, 1)) // 2) * 2
    th = max(2, min(th, _round_up(H, 2)))
    return th


# ---------------------------------------------------------------------------
# Pass 1: 3x3 conv (fused K = 9*Cin, one MXU dot per tile, bf16 in / f32 acc)
#         + per-tile per-channel sum / sum-of-squares partials
# ---------------------------------------------------------------------------
def _make_conv_stats_kernel(H, th, need_mask):
    def kernel(x_lo_ref, x_halo_ref, w_ref, y_ref, sum_ref, sq_ref):
        # x_lo_ref:   (1, th, W+2, Cin) bf16  rows [h*th, h*th+th) of padded NHWC in
        # x_halo_ref: (1, 2,  W+2, Cin) bf16  2-row halo directly below the block
        # w_ref:      (9*Cin, cpad)     bf16  tap-major fused weight
        # y_ref:      (1, th, W, cpad)  bf16  pre-BN conv output
        # sum_ref:    (1, 1, 1, cpad)   f32   per-tile channel sum
        # sq_ref:     (1, 1, 1, cpad)   f32   per-tile channel sum of squares
        w_out = y_ref.shape[2]
        cpad = y_ref.shape[3]
        cin = x_lo_ref.shape[3]

        # (th+2, W+2, Cin) halo window (one small VMEM append per tile).
        window = jnp.concatenate([x_lo_ref[0], x_halo_ref[0]], axis=0)

        # im2col in VMEM only: fused contraction K = 9*Cin -> a single MXU dot
        # (no per-tap K=Cin dots, no repeated f32 accumulator adds).
        taps = []
        for kh in range(3):
            for kw in range(3):
                taps.append(
                    window[kh:kh + th, kw:kw + w_out, :].reshape(th * w_out, cin))
        lhs = jnp.concatenate(taps, axis=1)                    # (th*W, 9*Cin) bf16

        acc = jnp.dot(lhs, w_ref[...], preferred_element_type=jnp.float32)

        if need_mask:
            # Zero output rows past the real image height so they contribute
            # nothing to y or to the batch statistics (tail tile when th ∤ H).
            row0 = pl.program_id(1) * th
            idx = jax.lax.broadcasted_iota(jnp.int32, (th * w_out, 1), 0)
            acc = jnp.where(idx < (H - row0) * w_out, acc, 0.0)

        # Stats from the f32 result while it is live; y stored as bf16 to halve
        # inter-pass HBM traffic.
        sum_ref[...] = jnp.sum(acc, axis=0).reshape(1, 1, 1, cpad)
        sq_ref[...] = jnp.sum(acc * acc, axis=0).reshape(1, 1, 1, cpad)
        y_ref[...] = acc.reshape(1, th, w_out, cpad).astype(y_ref.dtype)

    return kernel


# ---------------------------------------------------------------------------
# Pass 2: fused per-channel scale/shift (folded train-mode BN affine) + ReLU
# ---------------------------------------------------------------------------
def _bn_relu_kernel(y_ref, scale_ref, shift_ref, o_ref):
    y = y_ref[...].astype(jnp.float32)
    o_ref[...] = jnp.maximum(y * scale_ref[...] + shift_ref[...], 0.0)


def conv_block_forward(x, weight, bias, gamma, beta, *, eps=BN_EPS,
                       mxu_dtype=jnp.bfloat16, block_rows_target=512):
    """x: (N, Cin, H, W), weight: (Cout, Cin, 3, 3). Returns (N, Cout, H, W)."""
    N, Cin, H, W = x.shape
    Cout = weight.shape[0]
    cpad = _round_up(Cout, LANES)          # lane-dense output / matmul N dim

    th = _pick_block_rows(H, W, block_rows_target)     # even, >= 2
    n_hb = pl.cdiv(H, th)
    Hp = n_hb * th
    need_mask = (Hp != H)
    half_th = th // 2

    # NCHW -> NHWC once + spatial zero pad (1 left/right col, 1 top row, enough
    # bottom rows for the conv pad + row-tile tail).
    # TODO(synk): keep NHWC end-to-end in the surrounding model to drop these
    # boundary transposes entirely; the kernels themselves are pure NHWC.
    xh = jnp.transpose(x, (0, 2, 3, 1))
    xp = jnp.pad(xh, ((0, 0), (1, Hp + 1 - H), (1, 1), (0, 0))).astype(mxu_dtype)

    # (Cout, Cin, 3, 3) -> tap-major fused (9*Cin, cpad) weight for the K-fused dot.
    wk = jnp.transpose(weight, (2, 3, 1, 0)).reshape(9 * Cin, Cout)
    wk = jnp.pad(wk, ((0, 0), (0, cpad - Cout))).astype(mxu_dtype)

    # Conv bias is dropped: a per-channel constant is cancelled exactly by the
    # train-mode BatchNorm mean subtraction (the reference below includes it).
    del bias

    itemsize = jnp.dtype(mxu_dtype).itemsize
    flops1 = 2 * N * Hp * W * (9 * Cin) * cpad
    bytes1 = int(N * (Hp + 2 * n_hb) * (W + 2) * Cin * itemsize   # lo + halo DMA
                 + wk.size * itemsize                             # fused weight
                 + N * Hp * W * cpad * 2                          # bf16 y write
                 + 2 * N * n_hb * cpad * 4)                       # partial stats

    y, ch_sum, ch_sq = pl.pallas_call(
        _make_conv_stats_kernel(H, th, need_mask),
        out_shape=(
            jax.ShapeDtypeStruct((N, Hp, W, cpad), mxu_dtype),
            jax.ShapeDtypeStruct((N, n_hb, 1, cpad), jnp.float32),
            jax.ShapeDtypeStruct((N, n_hb, 1, cpad), jnp.float32),
        ),
        grid_spec=pltpu.PrefetchScalarGridSpec(
            num_scalar_prefetch=0,
            grid=(N, n_hb),
            in_specs=[
                pl.BlockSpec((1, th, W + 2, Cin), lambda n, h: (n, h, 0, 0)),
                # 2-row halo fetched as its own tiny block (no second full-size
                # th-row DMA of the same data).
                pl.BlockSpec((1, 2, W + 2, Cin),
                             lambda n, h: (n, (h + 1) * half_th, 0, 0)),
                pl.BlockSpec((9 * Cin, cpad), lambda n, h: (0, 0)),
            ],
            out_specs=[
                pl.BlockSpec((1, th, W, cpad), lambda n, h: (n, h, 0, 0)),
                # Per-tile partial stats -> no carried accumulator -> both grid
                # axes fully parallel (uses both v7x TCs even at N=1).
                pl.BlockSpec((1, 1, 1, cpad), lambda n, h: (n, h, 0, 0)),
                pl.BlockSpec((1, 1, 1, cpad), lambda n, h: (n, h, 0, 0)),
            ],
        ),
        compiler_params=pltpu.CompilerParams(
            dimension_semantics=("parallel", "parallel"),
            vmem_limit_bytes=32 * 1024 * 1024,
        ),
        cost_estimate=pl.CostEstimate(flops=int(flops1), transcendentals=0,
                                      bytes_accessed=bytes1),
    )(xp, xp, wk)

    # Tiny O(N*n_hb*Cout) fold: train-mode BN (biased var) + affine -> one FMA.
    # NOTE: E[x^2]-E[x]^2 in f32 can cancel when |mean| >> std; acceptable here
    # (clamped); use a shifted accumulation if tight BN accuracy is required.
    cnt = jnp.float32(N * H * W)
    total_sum = jnp.sum(ch_sum, axis=(0, 1)).reshape(1, cpad)
    total_sq = jnp.sum(ch_sq, axis=(0, 1)).reshape(1, cpad)
    mean = total_sum / cnt
    var = jnp.maximum(total_sq / cnt - mean * mean, 0.0)
    gamma_p = jnp.pad(gamma.astype(jnp.float32), (0, cpad - Cout)).reshape(1, cpad)
    beta_p = jnp.pad(beta.astype(jnp.float32), (0, cpad - Cout)).reshape(1, cpad)
    scale = gamma_p * jax.lax.rsqrt(var + eps)
    shift = beta_p - mean * scale

    # Pass 2: streaming bf16->f32 FMA + ReLU, large lane-dense tiles.
    M2 = N * Hp * W
    y_flat = y.reshape(M2, cpad)
    tm2_cap = max(8, ((16 << 20) // (12 * cpad)) // 8 * 8)   # keep blocks << VMEM
    tm2 = min(M2, min(8192, tm2_cap))

    out_flat = pl.pallas_call(
        _bn_relu_kernel,
        out_shape=jax.ShapeDtypeStruct((M2, cpad), jnp.float32),
        grid_spec=pltpu.PrefetchScalarGridSpec(
            num_scalar_prefetch=0,
            grid=(pl.cdiv(M2, tm2),),
            in_specs=[
                pl.BlockSpec((tm2, cpad), lambda i: (i, 0)),
                pl.BlockSpec((1, cpad), lambda i: (0, 0)),
                pl.BlockSpec((1, cpad), lambda i: (0, 0)),
            ],
            out_specs=pl.BlockSpec((tm2, cpad), lambda i: (i, 0)),
        ),
        compiler_params=pltpu.CompilerParams(
            dimension_semantics=("parallel",),
            vmem_limit_bytes=32 * 1024 * 1024,
        ),
        cost_estimate=pl.CostEstimate(
            flops=2 * M2 * cpad, transcendentals=0,
            bytes_accessed=int(M2 * cpad * (2 + 4) + 2 * cpad * 4)),
    )(y_flat, scale, shift)

    out = out_flat.reshape(N, Hp, W, cpad)[:, :H, :, :Cout]
    return jnp.transpose(out, (0, 3, 1, 2))               # back to NCHW (API)


def _reference(x, weight, bias, gamma, beta, eps=BN_EPS):
    """Pure-JAX f32 reference of the PyTorch ConvBlock forward (training mode)."""
    y = jax.lax.conv_general_dilated(
        x, weight, window_strides=(1, 1), padding=((1, 1), (1, 1)),
        dimension_numbers=("NCHW", "OIHW", "NCHW"))
    y = y + bias.reshape(1, -1, 1, 1)
    mean = jnp.mean(y, axis=(0, 2, 3), keepdims=True)
    var = jnp.mean((y - mean) ** 2, axis=(0, 2, 3), keepdims=True)
    y_hat = (y - mean) * jax.lax.rsqrt(var + eps)
    out = y_hat * gamma.reshape(1, -1, 1, 1) + beta.reshape(1, -1, 1, 1)
    return jnp.maximum(out, 0.0)


if __name__ == "__main__":
    key = jax.random.PRNGKey(0)
    N, Cin, Cout, H, W = 2, 4, 8, 16, 16

    k_x, k_w, k_b = jax.random.split(key, 3)
    x = jax.random.normal(k_x, (N, Cin, H, W), dtype=jnp.float32)

    fan_in = Cin * 3 * 3
    bound = 1.0 / (fan_in ** 0.5)
    weight = jax.random.uniform(k_w, (Cout, Cin, 3, 3), jnp.float32, -bound, bound)
    bias = jax.random.uniform(k_b, (Cout,), jnp.float32, -bound, bound)
    gamma = jnp.ones((Cout,), jnp.float32)   # BN weight default
    beta = jnp.zeros((Cout,), jnp.float32)   # BN bias default

    # block_rows_target=96 -> th=6: exercises the multi-row-tile grid AND the
    # tail-row masking path (th does not divide H); default 512 for real sizes.
    fwd = jax.jit(functools.partial(conv_block_forward, block_rows_target=96))

    y_out = jax.block_until_ready(fwd(x, weight, bias, gamma, beta))
    assert y_out.shape == (N, Cout, H, W)

    y_ref = jax.block_until_ready(_reference(x, weight, bias, gamma, beta))
    err = float(jnp.max(jnp.abs(y_out - y_ref)))
    # bf16 MXU inputs with f32 accumulation / f32 BN epilogue: loose tolerance,
    # still catches any halo / mask / stats / layout bug (those are O(1)).
    assert err < 1e-1, f"max abs err vs reference: {err}"
    assert bool(jnp.all(jnp.isfinite(y_out)))

    print("KERNEL_OK")
</pallas_src>

<mosaic_0001>
module attributes {stable_mosaic.version = 11 : i64} {
  func.func @kernel(%arg0: i32, %arg1: i32, %arg2: memref<1x6x18x4xbf16, #tpu.memory_space<vmem>>, %arg3: memref<1x2x18x4xbf16, #tpu.memory_space<vmem>>, %arg4: memref<36x128xbf16, #tpu.memory_space<vmem>>, %arg5: memref<1x6x16x128xbf16, #tpu.memory_space<vmem>>, %arg6: memref<1x1x1x128xf32, #tpu.memory_space<vmem>>, %arg7: memref<1x1x1x128xf32, #tpu.memory_space<vmem>>) attributes {dimension_semantics = [#tpu.dimension_semantics<parallel>, #tpu.dimension_semantics<parallel>], iteration_bounds = array<i64: 2, 3>, scalar_prefetch = 0 : i64, scratch_operands = 0 : i64, tpu.core_type = #tpu.core_type<tc>, window_params = [{transform_indices = @transform_0, window_bounds = array<i64: 1, 6, 18, 4>}, {transform_indices = @transform_1, window_bounds = array<i64: 1, 2, 18, 4>}, {pipeline_mode = #tpu.pipeline_mode<synchronous>, transform_indices = @transform_2, window_bounds = array<i64: 36, 128>}, {transform_indices = @transform_3, window_bounds = array<i64: 1, 6, 16, 128>}, {transform_indices = @transform_4, window_bounds = array<i64: 1, 1, 1, 128>}, {transform_indices = @transform_5, window_bounds = array<i64: 1, 1, 1, 128>}]} {
    %c0 = arith.constant 0 : index
    %c0_0 = arith.constant 0 : index
    %c0_1 = arith.constant 0 : index
    %c0_2 = arith.constant 0 : index
    %0 = vector.load %arg2[%c0, %c0_0, %c0_1, %c0_2] : memref<1x6x18x4xbf16, #tpu.memory_space<vmem>>, vector<1x6x18x4xbf16>
    %1 = vector.shape_cast %0 : vector<1x6x18x4xbf16> to vector<6x18x4xbf16>
    %c0_3 = arith.constant 0 : index
    %c0_4 = arith.constant 0 : index
    %c0_5 = arith.constant 0 : index
    %c0_6 = arith.constant 0 : index
    %2 = vector.load %arg3[%c0_3, %c0_4, %c0_5, %c0_6] : memref<1x2x18x4xbf16, #tpu.memory_space<vmem>>, vector<1x2x18x4xbf16>
    %3 = vector.shape_cast %2 : vector<1x2x18x4xbf16> to vector<2x18x4xbf16>
    %4 = tpu.concatenate %1, %3 in 0 : vector<6x18x4xbf16>, vector<2x18x4xbf16> -> vector<8x18x4xbf16>
    %5 = vector.extract_strided_slice %4 {offsets = [0, 0, 0], sizes = [6, 16, 4], strides = [1, 1, 1]} : vector<8x18x4xbf16> to vector<6x16x4xbf16>
    %6 = vector.shape_cast %5 : vector<6x16x4xbf16> to vector<96x4xbf16>
    %7 = vector.extract_strided_slice %4 {offsets = [0, 1, 0], sizes = [6, 16, 4], strides = [1, 1, 1]} : vector<8x18x4xbf16> to vector<6x16x4xbf16>
    %8 = vector.shape_cast %7 : vector<6x16x4xbf16> to vector<96x4xbf16>
    %9 = vector.extract_strided_slice %4 {offsets = [0, 2, 0], sizes = [6, 16, 4], strides = [1, 1, 1]} : vector<8x18x4xbf16> to vector<6x16x4xbf16>
    %10 = vector.shape_cast %9 : vector<6x16x4xbf16> to vector<96x4xbf16>
    %11 = vector.extract_strided_slice %4 {offsets = [1, 0, 0], sizes = [6, 16, 4], strides = [1, 1, 1]} : vector<8x18x4xbf16> to vector<6x16x4xbf16>
    %12 = vector.shape_cast %11 : vector<6x16x4xbf16> to vector<96x4xbf16>
    %13 = vector.extract_strided_slice %4 {offsets = [1, 1, 0], sizes = [6, 16, 4], strides = [1, 1, 1]} : vector<8x18x4xbf16> to vector<6x16x4xbf16>
    %14 = vector.shape_cast %13 : vector<6x16x4xbf16> to vector<96x4xbf16>
    %15 = vector.extract_strided_slice %4 {offsets = [1, 2, 0], sizes = [6, 16, 4], strides = [1, 1, 1]} : vector<8x18x4xbf16> to vector<6x16x4xbf16>
    %16 = vector.shape_cast %15 : vector<6x16x4xbf16> to vector<96x4xbf16>
    %17 = vector.extract_strided_slice %4 {offsets = [2, 0, 0], sizes = [6, 16, 4], strides = [1, 1, 1]} : vector<8x18x4xbf16> to vector<6x16x4xbf16>
    %18 = vector.shape_cast %17 : vector<6x16x4xbf16> to vector<96x4xbf16>
    %19 = vector.extract_strided_slice %4 {offsets = [2, 1, 0], sizes = [6, 16, 4], strides = [1, 1, 1]} : vector<8x18x4xbf16> to vector<6x16x4xbf16>
    %20 = vector.shape_cast %19 : vector<6x16x4xbf16> to vector<96x4xbf16>
    %21 = vector.extract_strided_slice %4 {offsets = [2, 2, 0], sizes = [6, 16, 4], strides = [1, 1, 1]} : vector<8x18x4xbf16> to vector<6x16x4xbf16>
    %22 = vector.shape_cast %21 : vector<6x16x4xbf16> to vector<96x4xbf16>
    %23 = tpu.concatenate %6, %8, %10, %12, %14, %16, %18, %20, %22 in 1 : vector<96x4xbf16>, vector<96x4xbf16>, vector<96x4xbf16>, vector<96x4xbf16>, vector<96x4xbf16>, vector<96x4xbf16>, vector<96x4xbf16>, vector<96x4xbf16>, vector<96x4xbf16> -> vector<96x36xbf16>
    %c0_7 = arith.constant 0 : index
    %c0_8 = arith.constant 0 : index
    %24 = vector.load %arg4[%c0_7, %c0_8] : memref<36x128xbf16, #tpu.memory_space<vmem>>, vector<36x128xbf16>
    %cst = arith.constant dense<0.000000e+00> : vector<96x128xf32>
    %25 = tpu.matmul %23, %24, %cst {dimension_numbers = #tpu.dot_dimension_numbers<[1], [0], [0], [1], [0, 0, 1, 1], [], []>} : vector<96x36xbf16>, vector<36x128xbf16>, vector<96x128xf32> -> vector<96x128xf32>
    %c6_i32 = arith.constant 6 : i32
    %26 = arith.muli %arg1, %c6_i32 : i32
    %27 = tpu.iota {dimensions = array<i32: 0>} : vector<96x1xi32>
    %c16_i32 = arith.constant 16 : i32
    %28 = arith.subi %c16_i32, %26 : i32
    %c16_i32_9 = arith.constant 16 : i32
    %29 = arith.muli %28, %c16_i32_9 : i32
    %30 = vector.broadcast %29 : i32 to vector<96x1xi32>
    %31 = arith.cmpi slt, %27, %30 : vector<96x1xi32>
    %cst_10 = arith.constant 0.000000e+00 : f32
    %32 = vector.shape_cast %31 : vector<96x1xi1> to vector<96x1xi1>
    %33 = vector.broadcast %32 : vector<96x1xi1> to vector<96x128xi1>
    %34 = vector.broadcast %cst_10 : f32 to vector<96x128xf32>
    %35 = arith.select %33, %25, %34 : vector<96x128xi1>, vector<96x128xf32>
    %cst_11 = arith.constant dense<0.000000e+00> : vector<128xf32>
    %36 = vector.multi_reduction <add>, %35, %cst_11 [0] : vector<96x128xf32> to vector<128xf32>
    %37 = vector.shape_cast %36 : vector<128xf32> to vector<1x1x1x128xf32>
    %c0_12 = arith.constant 0 : index
    %c0_13 = arith.constant 0 : index
    %c0_14 = arith.constant 0 : index
    %c0_15 = arith.constant 0 : index
    %38 = vector.load %arg6[%c0_12, %c0_13, %c0_14, %c0_15] : memref<1x1x1x128xf32, #tpu.memory_space<vmem>>, vector<1x1x1x128xf32>
    tpu.vector_store %arg6[%c0_12, %c0_13, %c0_14, %c0_15], %37 {strides = array<i32>} : memref<1x1x1x128xf32, #tpu.memory_space<vmem>>, vector<1x1x1x128xf32>,
    %39 = arith.mulf %35, %35 : vector<96x128xf32>
    %cst_16 = arith.constant dense<0.000000e+00> : vector<128xf32>
    %40 = vector.multi_reduction <add>, %39, %cst_16 [0] : vector<96x128xf32> to vector<128xf32>
    %41 = vector.shape_cast %40 : vector<128xf32> to vector<1x1x1x128xf32>
    %c0_17 = arith.constant 0 : index
    %c0_18 = arith.constant 0 : index
    %c0_19 = arith.constant 0 : index
    %c0_20 = arith.constant 0 : index
    %42 = vector.load %arg7[%c0_17, %c0_18, %c0_19, %c0_20] : memref<1x1x1x128xf32, #tpu.memory_space<vmem>>, vector<1x1x1x128xf32>
    tpu.vector_store %arg7[%c0_17, %c0_18, %c0_19, %c0_20], %41 {strides = array<i32>} : memref<1x1x1x128xf32, #tpu.memory_space<vmem>>, vector<1x1x1x128xf32>,
    %43 = vector.shape_cast %35 : vector<96x128xf32> to vector<1x6x16x128xf32>
    %44 = arith.truncf %43 : vector<1x6x16x128xf32> to vector<1x6x16x128xbf16>
    %c0_21 = arith.constant 0 : index
    %c0_22 = arith.constant 0 : index
    %c0_23 = arith.constant 0 : index
    %c0_24 = arith.constant 0 : index
    %45 = vector.load %arg5[%c0_21, %c0_22, %c0_23, %c0_24] : memref<1x6x16x128xbf16, #tpu.memory_space<vmem>>, vector<1x6x16x128xbf16>
    tpu.vector_store %arg5[%c0_21, %c0_22, %c0_23, %c0_24], %44 {strides = array<i32>} : memref<1x6x16x128xbf16, #tpu.memory_space<vmem>>, vector<1x6x16x128xbf16>,
    return
  }
  func.func @transform_0(%arg0: i32, %arg1: i32) -> (i32, i32, i32, i32) {
    %c0_i32 = arith.constant 0 : i32
    %c0_i32_0 = arith.constant 0 : i32
    %c0_i32_1 = arith.constant 0 : i32
    return %arg0, %arg1, %c0_i32, %c0_i32_0 : i32, i32, i32, i32
  }
  func.func @transform_1(%arg0: i32, %arg1: i32) -> (i32, i32, i32, i32) {
    %c1_i32 = arith.constant 1 : i32
    %0 = arith.addi %arg1, %c1_i32 : i32
    %c3_i32 = arith.constant 3 : i32
    %1 = arith.muli %0, %c3_i32 : i32
    %c0_i32 = arith.constant 0 : i32
    %c0_i32_0 = arith.constant 0 : i32
    %c0_i32_1 = arith.constant 0 : i32
    return %arg0, %1, %c0_i32, %c0_i32_0 : i32, i32, i32, i32
  }
  func.func @transform_2(%arg0: i32, %arg1: i32) -> (i32, i32) {
    %c0_i32 = arith.constant 0 : i32
    %c0_i32_0 = arith.constant 0 : i32
    %c0_i32_1 = arith.constant 0 : i32
    return %c0_i32, %c0_i32_0 : i32, i32
  }
  func.func @transform_3(%arg0: i32, %arg1: i32) -> (i32, i32, i32, i32) {
    %c0_i32 = arith.constant 0 : i32
    %c0_i32_0 = arith.constant 0 : i32
    %c0_i32_1 = arith.constant 0 : i32
    return %arg0, %arg1, %c0_i32, %c0_i32_0 : i32, i32, i32, i32
  }
  func.func @transform_4(%arg0: i32, %arg1: i32) -> (i32, i32, i32, i32) {
    %c0_i32 = arith.constant 0 : i32
    %c0_i32_0 = arith.constant 0 : i32
    %c0_i32_1 = arith.constant 0 : i32
    return %arg0, %arg1, %c0_i32, %c0_i32_0 : i32, i32, i32, i32
  }
  func.func @transform_5(%arg0: i32, %arg1: i32) -> (i32, i32, i32, i32) {
    %c0_i32 = arith.constant 0 : i32
    %c0_i32_0 = arith.constant 0 : i32
    %c0_i32_1 = arith.constant 0 : i32
    return %arg0, %arg1, %c0_i32, %c0_i32_0 : i32, i32, i32, i32
  }
}

module attributes {stable_mosaic.version = 11 : i64} {
  func.func @_bn_relu_kernel(%arg0: i32, %arg1: memref<576x128xbf16, #tpu.memory_space<vmem>>, %arg2: memref<1x128xf32, #tpu.memory_space<vmem>>, %arg3: memref<1x128xf32, #tpu.memory_space<vmem>>, %arg4: memref<576x128xf32, #tpu.memory_space<vmem>>) attributes {dimension_semantics = [#tpu.dimension_semantics<parallel>], iteration_bounds = array<i64: 1>, scalar_prefetch = 0 : i64, scratch_operands = 0 : i64, tpu.core_type = #tpu.core_type<tc>, window_params = [{transform_indices = @transform_0, window_bounds = array<i64: 576, 128>}, {pipeline_mode = #tpu.pipeline_mode<synchronous>, transform_indices = @transform_1, window_bounds = array<i64: 1, 128>}, {pipeline_mode = #tpu.pipeline_mode<synchronous>, transform_indices = @transform_2, window_bounds = array<i64: 1, 128>}, {transform_indices = @transform_3, window_bounds = array<i64: 576, 128>}]} {
    %c0 = arith.constant 0 : index
    %c0_0 = arith.constant 0 : index
    %0 = vector.load %arg1[%c0, %c0_0] : memref<576x128xbf16, #tpu.memory_space<vmem>>, vector<576x128xbf16>
    %1 = arith.extf %0 : vector<576x128xbf16> to vector<576x128xf32>
    %c0_1 = arith.constant 0 : index
    %c0_2 = arith.constant 0 : index
    %2 = vector.load %arg2[%c0_1, %c0_2] : memref<1x128xf32, #tpu.memory_space<vmem>>, vector<1x128xf32>
    %3 = vector.broadcast %2 : vector<1x128xf32> to vector<576x128xf32>
    %4 = arith.mulf %1, %3 : vector<576x128xf32>
    %c0_3 = arith.constant 0 : index
    %c0_4 = arith.constant 0 : index
    %5 = vector.load %arg3[%c0_3, %c0_4] : memref<1x128xf32, #tpu.memory_space<vmem>>, vector<1x128xf32>
    %6 = vector.broadcast %5 : vector<1x128xf32> to vector<576x128xf32>
    %7 = arith.addf %4, %6 : vector<576x128xf32>
    %cst = arith.constant 0.000000e+00 : f32
    %8 = vector.broadcast %cst : f32 to vector<576x128xf32>
    %9 = arith.maximumf %7, %8 : vector<576x128xf32>
    %c0_5 = arith.constant 0 : index
    %c0_6 = arith.constant 0 : index
    %10 = vector.load %arg4[%c0_5, %c0_6] : memref<576x128xf32, #tpu.memory_space<vmem>>, vector<576x128xf32>
    tpu.vector_store %arg4[%c0_5, %c0_6], %9 {strides = array<i32>} : memref<576x128xf32, #tpu.memory_space<vmem>>, vector<576x128xf32>,
    return
  }
  func.func @transform_0(%arg0: i32) -> (i32, i32) {
    %c0_i32 = arith.constant 0 : i32
    %c0_i32_0 = arith.constant 0 : i32
    return %arg0, %c0_i32 : i32, i32
  }
  func.func @transform_1(%arg0: i32) -> (i32, i32) {
    %c0_i32 = arith.constant 0 : i32
    %c0_i32_0 = arith.constant 0 : i32
    %c0_i32_1 = arith.constant 0 : i32
    return %c0_i32, %c0_i32_0 : i32, i32
  }
  func.func @transform_2(%arg0: i32) -> (i32, i32) {
    %c0_i32 = arith.constant 0 : i32
    %c0_i32_0 = arith.constant 0 : i32
    %c0_i32_1 = arith.constant 0 : i32
    return %c0_i32, %c0_i32_0 : i32, i32
  }
  func.func @transform_3(%arg0: i32) -> (i32, i32) {
    %c0_i32 = arith.constant 0 : i32
    %c0_i32_0 = arith.constant 0 : i32
    return %arg0, %c0_i32 : i32, i32
  }
}

</mosaic_0001>

<bundles_post_ra>
// kernel: conv_block_forward.3
= control target key start
LH: loop header
LB: loop body
LE: loop exit
PB: predicated region body
PF: predicated region fallthrough
CT: control target
= control target key end

     0   :  { %s1143_s0 = inlined_call_operand.vmem [shape: bf16[576,128], index: 0, kind: input, shape index: {}]   ;;  %s1144_s1 = inlined_call_operand.vmem [shape: f32[1,128], index: 1, kind: input, shape index: {}]   ;;  %s1145_s2 = inlined_call_operand.vmem [shape: f32[1,128], index: 2, kind: input, shape index: {}]   ;;  %s1146_s3 = inlined_call_operand.vmem [shape: f32[576,128], index: 3, kind: output, shape index: {}]  }
   0x1   :  { %v467_v0 = vld [vmem:[%s1143_s0] sm:$0xff]   ;;  %v610_v4 = vld [vmem:[%s1143_s0 + $0x8] sm:$0xff]   ;;  %v611_v5 = vld [vmem:[%s1143_s0 + $0x10] sm:$0xff]  }
   0x2   :  { %v671_v1 = vld [vmem:[%s1144_s1] ss:$0 sm:$0xff]  ;;  %v468_v2 = vunpack.c.l.bf16 %v467_v0  ;;  %v469_v3 = vunpack.c.h.bf16 %v467_v0  ;;  %v612_v6 = vld [vmem:[%s1143_s0 + $0x18] sm:$0xff]   ;;  %v472_v8 = vunpack.c.l.bf16 %v610_v4  ;;  %v473_v9 = vunpack.c.h.bf16 %v610_v4  ;;  %v614_v33 = vld [vmem:[%s1143_s0 + $0x28] sm:$0xff]  }
   0x3   :  { %v685_v7 = vld [vmem:[%s1145_s2] ss:$0 sm:$0xff]  ;;  %v476_v10 = vunpack.c.l.bf16 %v611_v5  ;;  %v477_v11 = vunpack.c.h.bf16 %v611_v5  ;;  %v480_v14 = vunpack.c.l.bf16 %v612_v6  ;;  %v481_v15 = vunpack.c.h.bf16 %v612_v6  ;;  %v615_v34 = vld [vmem:[%s1143_s0 + $0x30] sm:$0xff]   ;;  %v616_v39 = vld [vmem:[%s1143_s0 + $0x38] sm:$0xff]  }
   0x4   :  { %v165_v12 = vmul.f32 %v468_v2, %v671_v1  ;;  %v166_v13 = vmul.f32 %v469_v3, %v671_v1  ;;  %v167_v16 = vmul.f32 %v472_v8, %v671_v1  ;;  %v168_v17 = vmul.f32 %v473_v9, %v671_v1  ;;  %v613_v28 = vld [vmem:[%s1143_s0 + $0x20] sm:$0xff]   ;;  %v618_v6 = vld [vmem:[%s1143_s0 + $0x48] sm:$0xff]   ;;  %v619_v8 = vld [vmem:[%s1143_s0 + $0x50] sm:$0xff]  }
   0x5   :  { %v169_v18 = vmul.f32 %v476_v10, %v671_v1  ;;  %v170_v19 = vmul.f32 %v477_v11, %v671_v1  ;;  %v171_v22 = vmul.f32 %v480_v14, %v671_v1  ;;  %v172_v23 = vmul.f32 %v481_v15, %v671_v1  ;;  %v617_v0 = vld [vmem:[%s1143_s0 + $0x40] sm:$0xff]  }
   0x6   :  { %v244_v20 = vadd.f32 %v685_v7, %v165_v12  ;;  %v245_v21 = vadd.f32 %v685_v7, %v166_v13  ;;  %v246_v24 = vadd.f32 %v685_v7, %v167_v16  ;;  %v247_v25 = vadd.f32 %v685_v7, %v168_v17  ;;  %v620_v13 = vld [vmem:[%s1143_s0 + $0x58] sm:$0xff]  }
   0x7   :  { %v248_v26 = vadd.f32 %v685_v7, %v169_v18  ;;  %v249_v27 = vadd.f32 %v685_v7, %v170_v19  ;;  %v250_v31 = vadd.f32 %v685_v7, %v171_v22  ;;  %v251_v32 = vadd.f32 %v685_v7, %v172_v23 }
   0x8   :  { %v316_v29 = vmax.f32 %v244_v20, 0.0  ;;  %v317_v30 = vmax.f32 %v245_v21, 0.0  ;;  %v318_v35 = vmax.f32 %v246_v24, 0.0  ;;  %v319_v36 = vmax.f32 %v247_v25, 0.0 }
   0x9   :  { %v320_v37 = vmax.f32 %v248_v26, 0.0  ;;  %v321_v38 = vmax.f32 %v249_v27, 0.0  ;;  %v322_v40 = vmax.f32 %v250_v31, 0.0  ;;  %v323_v41 = vmax.f32 %v251_v32, 0.0 }
   0xa   :  { %388 = vst [vmem:[%s1146_s3] sm:$0xff] %v316_v29  ;;  %389 = vst [vmem:[%s1146_s3 + $0x8] sm:$0xff] %v317_v30  ;;  %v484_v42 = vunpack.c.l.bf16 %v613_v28  ;;  %v485_v43 = vunpack.c.h.bf16 %v613_v28  ;;  %v488_v44 = vunpack.c.l.bf16 %v614_v33  ;;  %v489_v45 = vunpack.c.h.bf16 %v614_v33 }
   0xb   :  { %390 = vst [vmem:[%s1146_s3 + $0x10] sm:$0xff] %v318_v35  ;;  %391 = vst [vmem:[%s1146_s3 + $0x18] sm:$0xff] %v319_v36  ;;  %v492_v46 = vunpack.c.l.bf16 %v615_v34  ;;  %v493_v47 = vunpack.c.h.bf16 %v615_v34  ;;  %v496_v50 = vunpack.c.l.bf16 %v616_v39  ;;  %v497_v51 = vunpack.c.h.bf16 %v616_v39 }
   0xc   :  { %392 = vst [vmem:[%s1146_s3 + $0x20] sm:$0xff] %v320_v37  ;;  %393 = vst [vmem:[%s1146_s3 + $0x28] sm:$0xff] %v321_v38  ;;  %v173_v48 = vmul.f32 %v484_v42, %v671_v1  ;;  %v174_v49 = vmul.f32 %v485_v43, %v671_v1  ;;  %v175_v52 = vmul.f32 %v488_v44, %v671_v1  ;;  %v500_v16 = vunpack.c.l.bf16 %v617_v0  ;;  %v621_v38 = vld [vmem:[%s1143_s0 + $0x60] sm:$0xff]   ;;  %v622_v43 = vld [vmem:[%s1143_s0 + $0x68] sm:$0xff]  }
   0xd   :  { %394 = vst [vmem:[%s1146_s3 + $0x30] sm:$0xff] %v322_v40  ;;  %395 = vst [vmem:[%s1146_s3 + $0x38] sm:$0xff] %v323_v41  ;;  %v176_v53 = vmul.f32 %v489_v45, %v671_v1  ;;  %v177_v54 = vmul.f32 %v492_v46, %v671_v1  ;;  %v178_v55 = vmul.f32 %v493_v47, %v671_v1  ;;  %v501_v17 = vunpack.c.h.bf16 %v617_v0  ;;  %v623_v44 = vld [vmem:[%s1143_s0 + $0x70] sm:$0xff]  }
   0xe   :  { %v252_v56 = vadd.f32 %v685_v7, %v173_v48  ;;  %v253_v57 = vadd.f32 %v685_v7, %v174_v49  ;;  %v179_v58 = vmul.f32 %v496_v50, %v671_v1  ;;  %v180_v59 = vmul.f32 %v497_v51, %v671_v1  ;;  %v624_v49 = vld [vmem:[%s1143_s0 + $0x78] sm:$0xff]  }
   0xf   :  { %v254_v60 = vadd.f32 %v685_v7, %v175_v52  ;;  %v255_v61 = vadd.f32 %v685_v7, %v176_v53  ;;  %v256_v62 = vadd.f32 %v685_v7, %v177_v54  ;;  %v257_v63 = vadd.f32 %v685_v7, %v178_v55 }
  0x10   :  { %v324_v2 = vmax.f32 %v252_v56, 0.0  ;;  %v325_v3 = vmax.f32 %v253_v57, 0.0  ;;  %v258_v4 = vadd.f32 %v685_v7, %v179_v58  ;;  %v259_v5 = vadd.f32 %v685_v7, %v180_v59 }
  0x11   :  { %v326_v9 = vmax.f32 %v254_v60, 0.0  ;;  %v327_v10 = vmax.f32 %v255_v61, 0.0  ;;  %v328_v11 = vmax.f32 %v256_v62, 0.0  ;;  %v329_v12 = vmax.f32 %v257_v63, 0.0 }
  0x12   :  { %396 = vst [vmem:[%s1146_s3 + $0x40] sm:$0xff] %v324_v2  ;;  %397 = vst [vmem:[%s1146_s3 + $0x48] sm:$0xff] %v325_v3  ;;  %v330_v14 = vmax.f32 %v258_v4, 0.0  ;;  %v331_v15 = vmax.f32 %v259_v5, 0.0  ;;  %v504_v18 = vunpack.c.l.bf16 %v618_v6  ;;  %v505_v19 = vunpack.c.h.bf16 %v618_v6 }
  0x13   :  { %398 = vst [vmem:[%s1146_s3 + $0x50] sm:$0xff] %v326_v9  ;;  %399 = vst [vmem:[%s1146_s3 + $0x58] sm:$0xff] %v327_v10  ;;  %v508_v20 = vunpack.c.l.bf16 %v619_v8  ;;  %v509_v21 = vunpack.c.h.bf16 %v619_v8  ;;  %v181_v22 = vmul.f32 %v500_v16, %v671_v1  ;;  %v182_v23 = vmul.f32 %v501_v17, %v671_v1  ;;  %v626_v17 = vld [vmem:[%s1143_s0 + $0x88] sm:$0xff]  }
  0x14   :  { %400 = vst [vmem:[%s1146_s3 + $0x60] sm:$0xff] %v328_v11  ;;  %401 = vst [vmem:[%s1146_s3 + $0x68] sm:$0xff] %v329_v12  ;;  %v512_v24 = vunpack.c.l.bf16 %v620_v13  ;;  %v513_v25 = vunpack.c.h.bf16 %v620_v13  ;;  %v183_v26 = vmul.f32 %v504_v18, %v671_v1  ;;  %v184_v27 = vmul.f32 %v505_v19, %v671_v1  ;;  %v625_v12 = vld [vmem:[%s1143_s0 + $0x80] sm:$0xff]   ;;  %v627_v18 = vld [vmem:[%s1143_s0 + $0x90] sm:$0xff]  }
  0x15   :  { %402 = vst [vmem:[%s1146_s3 + $0x70] sm:$0xff] %v330_v14  ;;  %403 = vst [vmem:[%s1146_s3 + $0x78] sm:$0xff] %v331_v15  ;;  %v185_v28 = vmul.f32 %v508_v20, %v671_v1  ;;  %v186_v29 = vmul.f32 %v509_v21, %v671_v1  ;;  %v260_v30 = vadd.f32 %v685_v7, %v181_v22  ;;  %v516_v52 = vunpack.c.l.bf16 %v621_v38 }
  0x16   :  { %v261_v31 = vadd.f32 %v685_v7, %v182_v23  ;;  %v187_v32 = vmul.f32 %v512_v24, %v671_v1  ;;  %v188_v33 = vmul.f32 %v513_v25, %v671_v1  ;;  %v262_v34 = vadd.f32 %v685_v7, %v183_v26  ;;  %v628_v23 = vld [vmem:[%s1143_s0 + $0x98] sm:$0xff]  }
  0x17   :  { %v263_v35 = vadd.f32 %v685_v7, %v184_v27  ;;  %v264_v36 = vadd.f32 %v685_v7, %v185_v28  ;;  %v265_v37 = vadd.f32 %v685_v7, %v186_v29  ;;  %v332_v39 = vmax.f32 %v260_v30, 0.0 }
  0x18   :  { %v333_v40 = vmax.f32 %v261_v31, 0.0  ;;  %v266_v41 = vadd.f32 %v685_v7, %v187_v32  ;;  %v267_v42 = vadd.f32 %v685_v7, %v188_v33  ;;  %v334_v45 = vmax.f32 %v262_v34, 0.0 }
  0x19   :  { %v335_v46 = vmax.f32 %v263_v35, 0.0  ;;  %v336_v47 = vmax.f32 %v264_v36, 0.0  ;;  %v337_v48 = vmax.f32 %v265_v37, 0.0  ;;  %404 = vst [vmem:[%s1146_s3 + $0x80] sm:$0xff] %v332_v39  ;;  %v517_v53 = vunpack.c.h.bf16 %v621_v38 }
  0x1a   :  { %405 = vst [vmem:[%s1146_s3 + $0x88] sm:$0xff] %v333_v40  ;;  %v338_v50 = vmax.f32 %v266_v41, 0.0  ;;  %v339_v51 = vmax.f32 %v267_v42, 0.0  ;;  %406 = vst [vmem:[%s1146_s3 + $0x90] sm:$0xff] %v334_v45  ;;  %v520_v54 = vunpack.c.l.bf16 %v622_v43  ;;  %v521_v55 = vunpack.c.h.bf16 %v622_v43 }
  0x1b   :  { %407 = vst [vmem:[%s1146_s3 + $0x98] sm:$0xff] %v335_v46  ;;  %408 = vst [vmem:[%s1146_s3 + $0xa0] sm:$0xff] %v336_v47  ;;  %v524_v56 = vunpack.c.l.bf16 %v623_v44  ;;  %v525_v57 = vunpack.c.h.bf16 %v623_v44  ;;  %v189_v58 = vmul.f32 %v516_v52, %v671_v1  ;;  %v190_v59 = vmul.f32 %v517_v53, %v671_v1  ;;  %v630_v53 = vld [vmem:[%s1143_s0 + $0xa8] sm:$0xff]  }
  0x1c   :  { %409 = vst [vmem:[%s1146_s3 + $0xa8] sm:$0xff] %v337_v48  ;;  %410 = vst [vmem:[%s1146_s3 + $0xb0] sm:$0xff] %v338_v50  ;;  %v528_v60 = vunpack.c.l.bf16 %v624_v49  ;;  %v529_v61 = vunpack.c.h.bf16 %v624_v49  ;;  %v191_v62 = vmul.f32 %v520_v54, %v671_v1  ;;  %v192_v63 = vmul.f32 %v521_v55, %v671_v1  ;;  %v629_v48 = vld [vmem:[%s1143_s0 + $0xa0] sm:$0xff]   ;;  %v631_v54 = vld [vmem:[%s1143_s0 + $0xb0] sm:$0xff]  }
  0x1d   :  { %411 = vst [vmem:[%s1146_s3 + $0xb8] sm:$0xff] %v339_v51  ;;  %v193_v0 = vmul.f32 %v524_v56, %v671_v1  ;;  %v194_v2 = vmul.f32 %v525_v57, %v671_v1  ;;  %v268_v3 = vadd.f32 %v685_v7, %v189_v58  ;;  %v269_v4 = vadd.f32 %v685_v7, %v190_v59  ;;  %v632_v59 = vld [vmem:[%s1143_s0 + $0xb8] sm:$0xff]  }
  0x1e   :  { %v195_v5 = vmul.f32 %v528_v60, %v671_v1  ;;  %v196_v6 = vmul.f32 %v529_v61, %v671_v1  ;;  %v270_v8 = vadd.f32 %v685_v7, %v191_v62  ;;  %v271_v9 = vadd.f32 %v685_v7, %v192_v63 }
  0x1f   :  { %v272_v10 = vadd.f32 %v685_v7, %v193_v0  ;;  %v273_v11 = vadd.f32 %v685_v7, %v194_v2  ;;  %v340_v13 = vmax.f32 %v268_v3, 0.0  ;;  %v341_v14 = vmax.f32 %v269_v4, 0.0 }
  0x20   :  { %v274_v15 = vadd.f32 %v685_v7, %v195_v5  ;;  %v275_v16 = vadd.f32 %v685_v7, %v196_v6  ;;  %v342_v19 = vmax.f32 %v270_v8, 0.0  ;;  %v343_v20 = vmax.f32 %v271_v9, 0.0 }
  0x21   :  { %v344_v21 = vmax.f32 %v272_v10, 0.0  ;;  %v345_v22 = vmax.f32 %v273_v11, 0.0  ;;  %412 = vst [vmem:[%s1146_s3 + $0xc0] sm:$0xff] %v340_v13  ;;  %413 = vst [vmem:[%s1146_s3 + $0xc8] sm:$0xff] %v341_v14  ;;  %v532_v26 = vunpack.c.l.bf16 %v625_v12  ;;  %v533_v27 = vunpack.c.h.bf16 %v625_v12 }
  0x22   :  { %v346_v24 = vmax.f32 %v274_v15, 0.0  ;;  %v347_v25 = vmax.f32 %v275_v16, 0.0  ;;  %414 = vst [vmem:[%s1146_s3 + $0xd0] sm:$0xff] %v342_v19  ;;  %415 = vst [vmem:[%s1146_s3 + $0xd8] sm:$0xff] %v343_v20  ;;  %v536_v28 = vunpack.c.l.bf16 %v626_v17  ;;  %v537_v29 = vunpack.c.h.bf16 %v626_v17 }
  0x23   :  { %416 = vst [vmem:[%s1146_s3 + $0xe0] sm:$0xff] %v344_v21  ;;  %417 = vst [vmem:[%s1146_s3 + $0xe8] sm:$0xff] %v345_v22  ;;  %v540_v30 = vunpack.c.l.bf16 %v627_v18  ;;  %v541_v31 = vunpack.c.h.bf16 %v627_v18  ;;  %v197_v32 = vmul.f32 %v532_v26, %v671_v1  ;;  %v198_v33 = vmul.f32 %v533_v27, %v671_v1  ;;  %v633_v22 = vld [vmem:[%s1143_s0 + $0xc0] sm:$0xff]   ;;  %v634_v27 = vld [vmem:[%s1143_s0 + $0xc8] sm:$0xff]  }
  0x24   :  { %418 = vst [vmem:[%s1146_s3 + $0xf0] sm:$0xff] %v346_v24  ;;  %419 = vst [vmem:[%s1146_s3 + $0xf8] sm:$0xff] %v347_v25  ;;  %v544_v34 = vunpack.c.l.bf16 %v628_v23  ;;  %v545_v35 = vunpack.c.h.bf16 %v628_v23  ;;  %v199_v36 = vmul.f32 %v536_v28, %v671_v1  ;;  %v200_v37 = vmul.f32 %v537_v29, %v671_v1  ;;  %v635_v28 = vld [vmem:[%s1143_s0 + $0xd0] sm:$0xff]  }
  0x25   :  { %v201_v38 = vmul.f32 %v540_v30, %v671_v1  ;;  %v202_v39 = vmul.f32 %v541_v31, %v671_v1  ;;  %v276_v40 = vadd.f32 %v685_v7, %v197_v32  ;;  %v277_v41 = vadd.f32 %v685_v7, %v198_v33  ;;  %v636_v33 = vld [vmem:[%s1143_s0 + $0xd8] sm:$0xff]  }
  0x26   :  { %v203_v42 = vmul.f32 %v544_v34, %v671_v1  ;;  %v204_v43 = vmul.f32 %v545_v35, %v671_v1  ;;  %v278_v44 = vadd.f32 %v685_v7, %v199_v36  ;;  %v279_v45 = vadd.f32 %v685_v7, %v200_v37 }
  0x27   :  { %v280_v46 = vadd.f32 %v685_v7, %v201_v38  ;;  %v281_v47 = vadd.f32 %v685_v7, %v202_v39  ;;  %v348_v49 = vmax.f32 %v276_v40, 0.0  ;;  %v349_v50 = vmax.f32 %v277_v41, 0.0 }
  0x28   :  { %v282_v51 = vadd.f32 %v685_v7, %v203_v42  ;;  %v283_v52 = vadd.f32 %v685_v7, %v204_v43  ;;  %v350_v55 = vmax.f32 %v278_v44, 0.0  ;;  %v351_v56 = vmax.f32 %v279_v45, 0.0 }
  0x29   :  { %v352_v57 = vmax.f32 %v280_v46, 0.0  ;;  %v353_v58 = vmax.f32 %v281_v47, 0.0  ;;  %420 = vst [vmem:[%s1146_s3 + $0x100] sm:$0xff] %v348_v49  ;;  %421 = vst [vmem:[%s1146_s3 + $0x108] sm:$0xff] %v349_v50  ;;  %v548_v62 = vunpack.c.l.bf16 %v629_v48  ;;  %v549_v63 = vunpack.c.h.bf16 %v629_v48 }
  0x2a   :  { %v354_v60 = vmax.f32 %v282_v51, 0.0  ;;  %v355_v61 = vmax.f32 %v283_v52, 0.0  ;;  %422 = vst [vmem:[%s1146_s3 + $0x110] sm:$0xff] %v350_v55  ;;  %423 = vst [vmem:[%s1146_s3 + $0x118] sm:$0xff] %v351_v56  ;;  %v552_v0 = vunpack.c.l.bf16 %v630_v53  ;;  %v553_v2 = vunpack.c.h.bf16 %v630_v53 }
  0x2b   :  { %424 = vst [vmem:[%s1146_s3 + $0x120] sm:$0xff] %v352_v57  ;;  %425 = vst [vmem:[%s1146_s3 + $0x128] sm:$0xff] %v353_v58  ;;  %v556_v3 = vunpack.c.l.bf16 %v631_v54  ;;  %v557_v4 = vunpack.c.h.bf16 %v631_v54  ;;  %v205_v5 = vmul.f32 %v548_v62, %v671_v1  ;;  %v206_v6 = vmul.f32 %v549_v63, %v671_v1  ;;  %v637_v58 = vld [vmem:[%s1143_s0 + $0xe0] sm:$0xff]   ;;  %v638_v63 = vld [vmem:[%s1143_s0 + $0xe8] sm:$0xff]  }
  0x2c   :  { %426 = vst [vmem:[%s1146_s3 + $0x130] sm:$0xff] %v354_v60  ;;  %427 = vst [vmem:[%s1146_s3 + $0x138] sm:$0xff] %v355_v61  ;;  %v560_v8 = vunpack.c.l.bf16 %v632_v59  ;;  %v561_v9 = vunpack.c.h.bf16 %v632_v59  ;;  %v207_v10 = vmul.f32 %v552_v0, %v671_v1  ;;  %v208_v11 = vmul.f32 %v553_v2, %v671_v1  ;;  %v639_v0 = vld [vmem:[%s1143_s0 + $0xf0] sm:$0xff]  }
  0x2d   :  { %v209_v12 = vmul.f32 %v556_v3, %v671_v1  ;;  %v210_v13 = vmul.f32 %v557_v4, %v671_v1  ;;  %v284_v14 = vadd.f32 %v685_v7, %v205_v5  ;;  %v285_v15 = vadd.f32 %v685_v7, %v206_v6  ;;  %v640_v6 = vld [vmem:[%s1143_s0 + $0xf8] sm:$0xff]  }
  0x2e   :  { %v211_v16 = vmul.f32 %v560_v8, %v671_v1  ;;  %v212_v17 = vmul.f32 %v561_v9, %v671_v1  ;;  %v286_v18 = vadd.f32 %v685_v7, %v207_v10  ;;  %v287_v19 = vadd.f32 %v685_v7, %v208_v11 }
  0x2f   :  { %v288_v20 = vadd.f32 %v685_v7, %v209_v12  ;;  %v289_v21 = vadd.f32 %v685_v7, %v210_v13  ;;  %v356_v23 = vmax.f32 %v284_v14, 0.0  ;;  %v357_v24 = vmax.f32 %v285_v15, 0.0 }
  0x30   :  { %v290_v25 = vadd.f32 %v685_v7, %v211_v16  ;;  %v291_v26 = vadd.f32 %v685_v7, %v212_v17  ;;  %v358_v29 = vmax.f32 %v286_v18, 0.0  ;;  %v359_v30 = vmax.f32 %v287_v19, 0.0 }
  0x31   :  { %v360_v31 = vmax.f32 %v288_v20, 0.0  ;;  %v361_v32 = vmax.f32 %v289_v21, 0.0  ;;  %428 = vst [vmem:[%s1146_s3 + $0x140] sm:$0xff] %v356_v23  ;;  %429 = vst [vmem:[%s1146_s3 + $0x148] sm:$0xff] %v357_v24  ;;  %v564_v36 = vunpack.c.l.bf16 %v633_v22  ;;  %v565_v37 = vunpack.c.h.bf16 %v633_v22 }
  0x32   :  { %v362_v34 = vmax.f32 %v290_v25, 0.0  ;;  %v363_v35 = vmax.f32 %v291_v26, 0.0  ;;  %430 = vst [vmem:[%s1146_s3 + $0x150] sm:$0xff] %v358_v29  ;;  %431 = vst [vmem:[%s1146_s3 + $0x158] sm:$0xff] %v359_v30  ;;  %v568_v38 = vunpack.c.l.bf16 %v634_v27  ;;  %v569_v39 = vunpack.c.h.bf16 %v634_v27 }
  0x33   :  { %432 = vst [vmem:[%s1146_s3 + $0x160] sm:$0xff] %v360_v31  ;;  %433 = vst [vmem:[%s1146_s3 + $0x168] sm:$0xff] %v361_v32  ;;  %v572_v40 = vunpack.c.l.bf16 %v635_v28  ;;  %v573_v41 = vunpack.c.h.bf16 %v635_v28  ;;  %v213_v42 = vmul.f32 %v564_v36, %v671_v1  ;;  %v214_v43 = vmul.f32 %v565_v37, %v671_v1  ;;  %v641_v32 = vld [vmem:[%s1143_s0 + $0x100] sm:$0xff]   ;;  %v642_v37 = vld [vmem:[%s1143_s0 + $0x108] sm:$0xff]  }
  0x34   :  { %434 = vst [vmem:[%s1146_s3 + $0x170] sm:$0xff] %v362_v34  ;;  %435 = vst [vmem:[%s1146_s3 + $0x178] sm:$0xff] %v363_v35  ;;  %v576_v44 = vunpack.c.l.bf16 %v636_v33  ;;  %v577_v45 = vunpack.c.h.bf16 %v636_v33  ;;  %v215_v46 = vmul.f32 %v568_v38, %v671_v1  ;;  %v216_v47 = vmul.f32 %v569_v39, %v671_v1  ;;  %v643_v38 = vld [vmem:[%s1143_s0 + $0x110] sm:$0xff]  }
  0x35   :  { %v217_v48 = vmul.f32 %v572_v40, %v671_v1  ;;  %v218_v49 = vmul.f32 %v573_v41, %v671_v1  ;;  %v292_v50 = vadd.f32 %v685_v7, %v213_v42  ;;  %v293_v51 = vadd.f32 %v685_v7, %v214_v43  ;;  %v644_v43 = vld [vmem:[%s1143_s0 + $0x118] sm:$0xff]  }
  0x36   :  { %v219_v52 = vmul.f32 %v576_v44, %v671_v1  ;;  %v220_v53 = vmul.f32 %v577_v45, %v671_v1  ;;  %v294_v54 = vadd.f32 %v685_v7, %v215_v46  ;;  %v295_v55 = vadd.f32 %v685_v7, %v216_v47 }
  0x37   :  { %v296_v56 = vadd.f32 %v685_v7, %v217_v48  ;;  %v297_v57 = vadd.f32 %v685_v7, %v218_v49  ;;  %v364_v59 = vmax.f32 %v292_v50, 0.0  ;;  %v365_v60 = vmax.f32 %v293_v51, 0.0 }
  0x38   :  { %v298_v61 = vadd.f32 %v685_v7, %v219_v52  ;;  %v299_v62 = vadd.f32 %v685_v7, %v220_v53  ;;  %v366_v2 = vmax.f32 %v294_v54, 0.0  ;;  %v367_v3 = vmax.f32 %v295_v55, 0.0 }
  0x39   :  { %v368_v4 = vmax.f32 %v296_v56, 0.0  ;;  %v369_v5 = vmax.f32 %v297_v57, 0.0  ;;  %436 = vst [vmem:[%s1146_s3 + $0x180] sm:$0xff] %v364_v59  ;;  %437 = vst [vmem:[%s1146_s3 + $0x188] sm:$0xff] %v365_v60  ;;  %v580_v10 = vunpack.c.l.bf16 %v637_v58  ;;  %v581_v11 = vunpack.c.h.bf16 %v637_v58 }
  0x3a   :  { %v370_v8 = vmax.f32 %v298_v61, 0.0  ;;  %v371_v9 = vmax.f32 %v299_v62, 0.0  ;;  %438 = vst [vmem:[%s1146_s3 + $0x190] sm:$0xff] %v366_v2  ;;  %439 = vst [vmem:[%s1146_s3 + $0x198] sm:$0xff] %v367_v3  ;;  %v584_v12 = vunpack.c.l.bf16 %v638_v63  ;;  %v585_v13 = vunpack.c.h.bf16 %v638_v63 }
  0x3b   :  { %440 = vst [vmem:[%s1146_s3 + $0x1a0] sm:$0xff] %v368_v4  ;;  %441 = vst [vmem:[%s1146_s3 + $0x1a8] sm:$0xff] %v369_v5  ;;  %v588_v14 = vunpack.c.l.bf16 %v639_v0  ;;  %v589_v15 = vunpack.c.h.bf16 %v639_v0  ;;  %v221_v16 = vmul.f32 %v580_v10, %v671_v1  ;;  %v222_v17 = vmul.f32 %v581_v11, %v671_v1 }
  0x3c   :  { %442 = vst [vmem:[%s1146_s3 + $0x1b0] sm:$0xff] %v370_v8  ;;  %443 = vst [vmem:[%s1146_s3 + $0x1b8] sm:$0xff] %v371_v9  ;;  %v592_v18 = vunpack.c.l.bf16 %v640_v6  ;;  %v593_v19 = vunpack.c.h.bf16 %v640_v6  ;;  %v223_v20 = vmul.f32 %v584_v12, %v671_v1  ;;  %v224_v21 = vmul.f32 %v585_v13, %v671_v1 }
  0x3d   :  { %v225_v22 = vmul.f32 %v588_v14, %v671_v1  ;;  %v226_v23 = vmul.f32 %v589_v15, %v671_v1  ;;  %v300_v24 = vadd.f32 %v685_v7, %v221_v16  ;;  %v301_v25 = vadd.f32 %v685_v7, %v222_v17 }
  0x3e   :  { %v227_v26 = vmul.f32 %v592_v18, %v671_v1  ;;  %v228_v27 = vmul.f32 %v593_v19, %v671_v1  ;;  %v302_v28 = vadd.f32 %v685_v7, %v223_v20  ;;  %v303_v29 = vadd.f32 %v685_v7, %v224_v21 }
  0x3f   :  { %v304_v30 = vadd.f32 %v685_v7, %v225_v22  ;;  %v305_v31 = vadd.f32 %v685_v7, %v226_v23  ;;  %v372_v33 = vmax.f32 %v300_v24, 0.0  ;;  %v373_v34 = vmax.f32 %v301_v25, 0.0 }
  0x40   :  { %v306_v35 = vadd.f32 %v685_v7, %v227_v26  ;;  %v307_v36 = vadd.f32 %v685_v7, %v228_v27  ;;  %v374_v39 = vmax.f32 %v302_v28, 0.0  ;;  %v375_v40 = vmax.f32 %v303_v29, 0.0 }
  0x41   :  { %v376_v41 = vmax.f32 %v304_v30, 0.0  ;;  %v377_v42 = vmax.f32 %v305_v31, 0.0  ;;  %444 = vst [vmem:[%s1146_s3 + $0x1c0] sm:$0xff] %v372_v33  ;;  %445 = vst [vmem:[%s1146_s3 + $0x1c8] sm:$0xff] %v373_v34  ;;  %v596_v46 = vunpack.c.l.bf16 %v641_v32  ;;  %v597_v47 = vunpack.c.h.bf16 %v641_v32 }
  0x42   :  { %v378_v44 = vmax.f32 %v306_v35, 0.0  ;;  %v379_v45 = vmax.f32 %v307_v36, 0.0  ;;  %446 = vst [vmem:[%s1146_s3 + $0x1d0] sm:$0xff] %v374_v39  ;;  %447 = vst [vmem:[%s1146_s3 + $0x1d8] sm:$0xff] %v375_v40  ;;  %v600_v48 = vunpack.c.l.bf16 %v642_v37  ;;  %v601_v49 = vunpack.c.h.bf16 %v642_v37 }
  0x43   :  { %448 = vst [vmem:[%s1146_s3 + $0x1e0] sm:$0xff] %v376_v41  ;;  %449 = vst [vmem:[%s1146_s3 + $0x1e8] sm:$0xff] %v377_v42  ;;  %v604_v50 = vunpack.c.l.bf16 %v643_v38  ;;  %v605_v51 = vunpack.c.h.bf16 %v643_v38  ;;  %v229_v52 = vmul.f32 %v596_v46, %v671_v1  ;;  %v230_v53 = vmul.f32 %v597_v47, %v671_v1 }
  0x44   :  { %450 = vst [vmem:[%s1146_s3 + $0x1f0] sm:$0xff] %v378_v44  ;;  %451 = vst [vmem:[%s1146_s3 + $0x1f8] sm:$0xff] %v379_v45  ;;  %v608_v54 = vunpack.c.l.bf16 %v644_v43  ;;  %v609_v55 = vunpack.c.h.bf16 %v644_v43  ;;  %v231_v56 = vmul.f32 %v600_v48, %v671_v1  ;;  %v232_v57 = vmul.f32 %v601_v49, %v671_v1 }
  0x45   :  { %v233_v58 = vmul.f32 %v604_v50, %v671_v1  ;;  %v234_v59 = vmul.f32 %v605_v51, %v671_v1  ;;  %v308_v60 = vadd.f32 %v685_v7, %v229_v52  ;;  %v309_v61 = vadd.f32 %v685_v7, %v230_v53 }
  0x46   :  { %v235_v62 = vmul.f32 %v608_v54, %v671_v1  ;;  %v236_v63 = vmul.f32 %v609_v55, %v671_v1  ;;  %v310_v0 = vadd.f32 %v685_v7, %v231_v56  ;;  %v311_v2 = vadd.f32 %v685_v7, %v232_v57 }
  0x47   :  { %v312_v3 = vadd.f32 %v685_v7, %v233_v58  ;;  %v313_v4 = vadd.f32 %v685_v7, %v234_v59  ;;  %v380_v5 = vmax.f32 %v308_v60, 0.0  ;;  %v381_v6 = vmax.f32 %v309_v61, 0.0 }
  0x48   :  { %v314_v8 = vadd.f32 %v685_v7, %v235_v62  ;;  %v315_v9 = vadd.f32 %v685_v7, %v236_v63  ;;  %v382_v10 = vmax.f32 %v310_v0, 0.0  ;;  %v383_v11 = vmax.f32 %v311_v2, 0.0 }
  0x49   :  { %v384_v12 = vmax.f32 %v312_v3, 0.0  ;;  %v385_v13 = vmax.f32 %v313_v4, 0.0  ;;  %452 = vst [vmem:[%s1146_s3 + $0x200] sm:$0xff] %v380_v5  ;;  %453 = vst [vmem:[%s1146_s3 + $0x208] sm:$0xff] %v381_v6 }
  0x4a   :  { %v386_v1 = vmax.f32 %v314_v8, 0.0  ;;  %v387_v14 = vmax.f32 %v315_v9, 0.0  ;;  %454 = vst [vmem:[%s1146_s3 + $0x210] sm:$0xff] %v382_v10  ;;  %455 = vst [vmem:[%s1146_s3 + $0x218] sm:$0xff] %v383_v11 }
  0x4b   :  { %456 = vst [vmem:[%s1146_s3 + $0x220] sm:$0xff] %v384_v12  ;;  %457 = vst [vmem:[%s1146_s3 + $0x228] sm:$0xff] %v385_v13 }
  0x4c   :  { %458 = vst [vmem:[%s1146_s3 + $0x230] sm:$0xff] %v386_v1  ;;  %459 = vst [vmem:[%s1146_s3 + $0x238] sm:$0xff] %v387_v14 }

// kernel: conv_block_forward.2
= control target key start
LH: loop header
LB: loop body
LE: loop exit
PB: predicated region body
PF: predicated region fallthrough
CT: control target
= control target key end

     0   :  { %s1748_s18 = smov 0   ;;  %s1750_s19 = smov 0   ;;  %s2276_s0 = inlined_call_operand.vmem [shape: bf16[2,20,18,4], index: 0, kind: input, shape index: {}, may-alias: {0,1}]   ;;  %s2277_s1 = inlined_call_operand.vmem [shape: bf16[2,20,18,4], index: 1, kind: input, shape index: {}, may-alias: {0,1}]   ;;  %s2278_s2 = inlined_call_operand.vmem [shape: bf16[36,128], index: 2, kind: input, shape index: {}]   ;;  %s2279_s3 = inlined_call_operand.vmem [shape: bf16[2,18,16,128], index: 3, kind: output, shape index: {0}]   ;;  %s2280_s4 = inlined_call_operand.vmem [shape: f32[2,3,1,128], index: 4, kind: output, shape index: {1}]   ;;  %s2281_s5 = inlined_call_operand.vmem [shape: f32[2,3,1,128], index: 5, kind: output, shape index: {2}]  }
   0x1   :  { %s1752_s20 = smov 0   ;;  %s1754_s21 = smov 0  }
   0x2   :  { %s1756_s22 = smov 0  }
   0x3 LB: > { %s25_s23 = sadd.s32 1, %s1700_s20  ;;  %s28_s24 = sadd.s32 1, %s1704_s21  ;;  %s1708_s22 = sphi %s1756_s22, %s16_s22   ;;  %s1704_s21 = sphi %s1754_s21, %s2289_s21   ;;  %s1700_s20 = sphi %s1752_s20, %s2288_s20   ;;  %s1696_s19 = sphi %s1750_s19, %s2287_s19   ;;  %s1692_s18 = sphi %s1748_s18, %s2286_s18  }
   0x4   : > { %p26_p0 = scmp.ge.s32.totalorder %s25_s23, 3  ;;  %p1462_p1 = scmp.ge.s32.totalorder %s1708_s22, 1 }
   0x5   : > { %p254_p2 = scmp.lt.s32.totalorder %s1708_s22, 7 }
   0x6   : > { %s2291_s23 = smov (%p26_p0, %s25_s23), 0  ;;  %s2293_s24 = smov (!%p26_p0, %s28_s24), %s1704_s21 }
   0x7   : > { %p255_p3 = pnand %p1462_p1, %p254_p2  ;;  %p30_p4 = scmp.ge.s32.totalorder %s2293_s24, 2 }
   0x8   : > { %s1781_s25 = smul.u32 (!%p255_p3), 6, %s1692_s18  ;;  %p329_p5 = scmp.lt.s32.totalorder (!%p255_p3), %s1696_s19, 1  ;;  %vm574_vm0 = vcmask (!%p255_p3), 1042432   ;;  %vm575_vm1 = vcmask (!%p255_p3), 1046532   ;;  %vm409_vm2 = vsmask.f32 (!%p255_p3), 3328 }
   0x9   : > { %s2295_s24 = smov (%p30_p4, %s2293_s24), 0  ;;  %258 = sbr.rel (%p255_p3) target bundleno = 478 (0x1de), region = 32 }
   0xa   : > { %p331_p6 = scmp.lt.s32.totalorder (!%p255_p3), %s1781_s25, 19  ;;  %vm410_vm3 = vsmask.f32 (!%p255_p3), 7440  ;;  %s1710_s9 = smov (!%p255_p3), 12   ;;  %vm1839_vm4 = vmor (!%p255_p3), %vm574_vm0, %vm575_vm1  ;;  %vm998_vm6 = vcmask (!%p255_p3), 1041408   ;;  %vm855_vm7 = vcmask (!%p255_p3), 31744  }
   0xb   : > { %s344_s10 = sadd.s32 (!%p255_p3), 1, %s1692_s18  ;;  %s1711_s11 = smov (!%p255_p3), 24   ;;  %vm1882_vm5 = vmor (!%p255_p3), %vm409_vm2, %vm410_vm3  ;;  %vm874_vm8 = vcmask (!%p255_p3), 64512   ;;  %vm887_vm9 = vcmask (!%p255_p3), 97280   ;;  %vm900_vm10 = vcmask (!%p255_p3), 130048   ;;  %vm913_vm11 = vcmask (!%p255_p3), 162816  }
   0xc   : > { %s1860_s12 = smul.u32 (!%p255_p3), 6, %s344_s10  ;;  %s1712_s13 = smov (!%p255_p3), 20   ;;  %vm926_vm12 = vcmask (!%p255_p3), 195584   ;;  %vm939_vm13 = vcmask (!%p255_p3), 228352   ;;  %vm952_vm14 = vcmask (!%p255_p3), 261120   ;;  %vm985_vm15 = vcmask (!%p255_p3), 293888  }
   0xd   : > { %s1713_s14 = smov (!%p255_p3), 8   ;;  %s1715_s6 = smov (!%p255_p3), 16  }
   0xe   : > { %p349_p7 = scmp.lt.s32.totalorder (!%p255_p3), %s1860_s12, 19  ;;  %s1716_s15 = smov (!%p255_p3), 28  }
   0xf   : > { %s1717_s16 = smov (!%p255_p3), 32   ;;  %p362_p8 = scmp.lt.s32.totalorder (!%p255_p3), %s1781_s25, 17 }
  0x10   : > { %s2297_s19 = smov (!%p329_p5, %s1696_s19), 1  ;;  %s2299_s12 = smov (!%p349_p7, %s1860_s12), 19 }
  0x11   : > { %s1607_s26 = smul.u32 60, %s2297_s19  ;;  %p372_p9 = scmp.lt.s32.totalorder %s1692_s18, 2 }
  0x12   : > { %s332_s27 = scalar_select %p331_p6, %s1781_s25, 19 }
  0x13   : > { %s2303_s18 = smov (!%p372_p9, %s1692_s18), 2 }
  0x14   : > { %s1606_s28 = smul.u32 3, %s332_s27 }
  0x16   : > { %s335_s29 = sadd.s32 %s1607_s26, %s1606_s28  ;;  %s1714_s28 = smov 4  }
  0x17   : > { %s1463_s30 = sshll.u32 %s335_s29, 2  ;;  %s1608_s29 = smul.u32 3, %s2299_s12 }
  0x18   : > { %s1793_s8 = scalar_lea.vmem %s2276_s0, %s1463_s30 }
  0x19   : > { %v1796_v0 = vld [vmem:[%s1793_s8 + $0x18] sm:$0xf]  ;;  %v1799_v1 = vld [vmem:[%s1793_s8 + $0x1c] sm:$0xf]  ;;  %v388_v2 = vld [vmem:[%s1793_s8 + $0xc] sm:$0xf]  ;;  %s353_s30 = sadd.s32 %s1608_s29, %s1607_s26 }
  0x1a   : > { %v474_v3 = vshrl.u32 %v1799_v1, 16  ;;  %v1805_v4 = vcombine.low %v1796_v0, %v1799_v1  ;;  %v461_v5 = vshrl.u32 %v1796_v0, 16  ;;  %v464_v6 = vshll.u32 %v1796_v0, 16  ;;  %v1810_v7 = vld [vmem:[%s1793_s8 + $0x10] sm:$0xf]  ;;  %s1465_s26 = sshll.u32 %s353_s30, 2 }
  0x1b   : > { %v446_v8 = vshll.u32 %v1810_v7, 16  ;;  %v450_v9 = vshrl.u32 %v1810_v7, 16  ;;  %v1815_v10 = vcombine.low %v388_v2, %v1810_v7  ;;  %v437_v11 = vshrl.u32 %v388_v2, 16  ;;  %v1818_v12 = vld [vmem:[%s1793_s8 + $0x24] sm:$0xf]  ;;  %s1975_s12 = scalar_lea.vmem %s2277_s1, %s1465_s26 }
  0x1c   : > { %770 = vrot.lane.b32.xlu1 %v1805_v4, %s1710_s9  ;;  %v440_v13 = vshll.u32 %v388_v2, 16  ;;  %v1823_v14 = vld [vmem:[%s1793_s8 + $0x28] sm:$0xf]  ;;  %v485_v15 = vshrl.u32 %v1818_v12, 16  ;;  %v488_v16 = vshll.u32 %v1818_v12, 16  ;;  %v1469_v17 = vrot.slane %v388_v2, 9 }
  0x1d   : > { %v1827_v18 = vrot.slane %v450_v9, 4  ;;  %768 = vrot.lane.b32.xlu0 %v1815_v10, %s1710_s9  ;;  %v439_v19 = vrot.slane %v437_v11, 4  ;;  %v498_v20 = vshrl.u32 %v1823_v14, 16  ;;  %v1834_v21 = vcombine.low %v1818_v12, %v1823_v14  ;;  %v390_v22 = vld [vmem:[%s1793_s8 + $0x14] sm:$0x1] }
  0x1e   : > { %v442_v24 = vrot.slane %v440_v13, 5  ;;  %v586_v25 = vrot.slane %v1810_v7, 5  ;;  %v589_v26 = vrot.slane %v390_v22, 5  ;;  %v1846_v27 = vld [vmem:[%s1793_s8] sm:$0xf]  ;;  %v1470_v28 = vrot.slane %v1796_v0, 9 }
  0x1f   : > { %v1850_v29 = vld [vmem:[%s1793_s8 + $0x4] sm:$0xf]  ;;  %v387_v30 = vld [vmem:[%s1793_s8 + $0x8] sm:$0x1]  ;;  %v1468_v31 = vrot.slane %v1846_v27, 9  ;;  %v413_v32 = vshrl.u32 %v1846_v27, 16 }
  0x20   : > { %815 = vrot.lane.b32.xlu1 %v1834_v21, %s1711_s11  ;;  %v587_v33 = vsel %vm1839_vm4, %v1469_v17, %v586_v25  ;;  %v588_v34 = vrot.slane %v586_v25, 4  ;;  %v579_v35 = vrot.slane %v1850_v29, 5  ;;  %v582_v36 = vrot.slane %v387_v30, 5  ;;  %v1868_v41 = vld [vmem:[%s1793_s8 + $0x20] sm:$0x1] }
  0x21   : > { %813 = vrot.lane.b32.xlu0 %v1805_v4, %s1711_s11  ;;  %v415_v37 = vrot.slane %v413_v32, 4  ;;  %v416_v38 = vshll.u32 %v1846_v27, 16  ;;  %v422_v39 = vshll.u32 %v1850_v29, 16  ;;  %v426_v40 = vshrl.u32 %v1850_v29, 16 }
  0x22   : > { %v590_v42 = vsel %vm1839_vm4, %v588_v34, %v589_v26  ;;  %v580_v43 = vsel %vm1839_vm4, %v1468_v31, %v579_v35  ;;  %v581_v44 = vrot.slane %v579_v35, 4  ;;  %v432_v45 = vshll.u32 %v387_v30, 16  ;;  %v1668_v34 = vld [vmem:[%s2278_s2 + $0x8] sm:$0xff]  }
  0x23   : > { %v1489_v46 = vcombine.low %v587_v33, %v590_v42  ;;  %v418_v47 = vrot.slane %v416_v38, 5  ;;  %v424_v48 = vrot.slane %v422_v39, 5  ;;  %v428_v49 = vrot.slane %v426_v40, 4  ;;  %v1936_v38 = vld [vmem:[%s1793_s8 + $0x30] sm:$0xf] }
  0x24   : > { %v583_v50 = vsel %vm1839_vm4, %v581_v44, %v582_v36  ;;  %v434_v51 = vrot.slane %v432_v45, 5  ;;  %v593_v52 = vrot.slane %v1799_v1, 5  ;;  %v596_v53 = vrot.slane %v1868_v41, 5 }
  0x25   : > { %798 = vrot.lane.b32.xlu0 %v1489_v46, %s1712_s13  ;;  %v1488_v54 = vcombine.low %v580_v43, %v583_v50  ;;  %v419_v55 = vor.u32 %v418_v47, %v415_v37  ;;  %v429_v56 = vor.u32 %v428_v49, %v424_v48  ;;  %v443_v57 = vor.u32 %v442_v24, %v439_v19 }
  0x26   : > { %v594_v59 = vsel %vm1839_vm4, %v1470_v28, %v593_v52  ;;  %v595_v60 = vrot.slane %v593_v52, 4  ;;  %v448_v61 = vrot.slane %v446_v8, 5  ;;  %v456_v62 = vshll.u32 %v390_v22, 16  ;;  %v1916_v28 = vld [vmem:[%s1793_s8 + $0x2c] sm:$0x1] }
  0x27   : > { %753 = vrot.lane.b32.xlu1 %v1488_v54, %s1713_s14  ;;  %v420_v63 = vrot.slane %v419_v55, 4  ;;  %v430_v2 = vrot.slane %v429_v56, 4  ;;  %v444_v9 = vrot.slane %v443_v57, 4  ;;  %v463_v11 = vrot.slane %v461_v5, 4 }
  0x28   : > { %v597_v13 = vsel %vm1839_vm4, %v595_v60, %v596_v53  ;;  %v453_v17 = vor.u32 %v1827_v18, %v448_v61  ;;  %v458_v7 = vrot.slane %v456_v62, 5  ;;  %v466_v8 = vrot.slane %v464_v6, 5  ;;  %v1667_v18 = vld [vmem:[%s2278_s2] sm:$0xff]  }
  0x29   : > { %v425_v19 = vsel %vm1882_vm5, %v420_v63, %v424_v48  ;;  %v435_v22 = vsel %vm1882_vm5, %v430_v2, %v434_v51  ;;  %v1902_v24 = vcombine.low %v594_v59, %v597_v13  ;;  %v449_v5 = vsel %vm1882_vm5, %v444_v9, %v448_v61  ;;  %1580 = vmatprep.subr.bf16.mxu0 %v1667_v18  ;;  %v399_v59 = vld [vmem:[%s1793_s8 + $0x38] sm:$0x1] }
  0x2a   : > { %v1482_v0 = vcombine.low %v425_v19, %v435_v22  ;;  %v454_v6 = vrot.slane %v453_v17, 4  ;;  %v467_v25 = vor.u32 %v466_v8, %v463_v11  ;;  %v470_v26 = vshll.u32 %v1799_v1, 16  ;;  %1581 = vmatpush3.bf16.msra.mxu0 %v1667_v18  ;;  %1598 = vmatprep.subr.bf16.mxu1 %v1667_v18  ;;  %v1969_v17 = vld [vmem:[%s1793_s8 + $0x3c] sm:$0xf]  ;;  %v1979_v19 = vld [vmem:[%s1793_s8 + $0x40] sm:$0xf] }
  0x2b   : > { %755 = vrot.lane.b32.xlu1 %v1489_v46, %s1713_s14  ;;  %v476_v30 = vrot.slane %v474_v3, 4  ;;  %v480_v31 = vshll.u32 %v1868_v41, 16  ;;  %v487_v32 = vrot.slane %v485_v15, 4  ;;  %v490_v33 = vrot.slane %v488_v16, 5  ;;  %1582 = vmatprep.subr.bf16.mxu0 %v1668_v34 }
  0x2c   : > { %723 = vrot.lane.b32.xlu0 %v1482_v0, %s1714_s28  ;;  %v459_v1 = vsel %vm1882_vm5, %v454_v6, %v458_v7  ;;  %v468_v3 = vrot.slane %v467_v25, 4  ;;  %v472_v35 = vrot.slane %v470_v26, 5  ;;  %v494_v36 = vshll.u32 %v1823_v14, 16  ;;  %1601 = vmatpush3.bf16.msra.mxu1 %v1667_v18 }
  0x2d   : > { %v1483_v15 = vcombine.low %v449_v5, %v459_v1  ;;  %v491_v37 = vor.u32 %v490_v33, %v487_v32  ;;  %v500_v16 = vrot.slane %v498_v20, 4  ;;  %v482_v40 = vrot.slane %v480_v31, 5  ;;  %v1945_v20 = vld [vmem:[%s1793_s8 + $0x34] sm:$0xf]  ;;  %1599 = vmatprep.subr.bf16.mxu1 %v1668_v34 }
  0x2e   : > { %v477_v39 = vor.u32 %v476_v30, %v472_v35  ;;  %v496_v41 = vrot.slane %v494_v36, 5  ;;  %v504_v42 = vshll.u32 %v1916_v28, 16  ;;  %v473_v43 = vsel %vm1882_vm5, %v468_v3, %v472_v35  ;;  %1583 = vmatpush3.bf16.msra.mxu0 %v1668_v34  ;;  %v2007_v35 = vld [vmem:[%s1793_s8 + $0x44] sm:$0x1] }
  0x2f   : > { %800 = vrot.lane.b32.xlu1 %v1902_v24, %s1712_s13  ;;  %v492_v44 = vrot.slane %v491_v37, 4  ;;  %v509_v48 = vshrl.u32 %v1936_v38, 16  ;;  %v600_v49 = vrot.slane %v1823_v14, 5  ;;  %v512_v50 = vshll.u32 %v1936_v38, 16 }
  0x30   : > { %725 = vrot.lane.b32.xlu0 %v1483_v15, %s1714_s28  ;;  %v478_v45 = vrot.slane %v477_v39, 4  ;;  %v501_v46 = vor.u32 %v500_v16, %v496_v41  ;;  %v506_v47 = vrot.slane %v504_v42, 5  ;;  %v522_v54 = vshrl.u32 %v1945_v20, 16  ;;  %1602 = vmatpush3.bf16.msra.mxu1 %v1668_v34  ;;  %v1995_v34 = vld [vmem:[%s1975_s12 + $0x4] sm:$0xf] }
  0x31   : > { %v497_v52 = vsel %vm1882_vm5, %v492_v44, %v496_v41  ;;  %v511_v56 = vrot.slane %v509_v48, 4  ;;  %v514_v57 = vrot.slane %v512_v50, 5  ;;  %v518_v60 = vshll.u32 %v1945_v20, 16  ;;  %v405_v42 = vld [vmem:[%s1975_s12 + $0x8] sm:$0x1] }
  0x32   : > { %v483_v51 = vsel %vm1882_vm5, %v478_v45, %v482_v40  ;;  %v502_v53 = vrot.slane %v501_v46, 4  ;;  %v524_v61 = vrot.slane %v522_v54, 4  ;;  %v1471_v63 = vrot.slane %v1818_v12, 9  ;;  %v2035_v50 = vld [vmem:[%s1975_s12 + $0xc] sm:$0xf] }
  0x33   : > { %v1484_v55 = vcombine.low %v473_v43, %v483_v51  ;;  %v602_v2 = vrot.slane %v600_v49, 4  ;;  %v603_v9 = vrot.slane %v1916_v28, 5  ;;  %v515_v11 = vor.u32 %v514_v57, %v511_v56  ;;  %v1991_v28 = vld [vmem:[%s1975_s12] sm:$0xf] }
  0x34   : > { %783 = vrot.lane.b32.xlu0 %v1483_v15, %s1715_s6  ;;  %v507_v14 = vsel %vm1882_vm5, %v502_v53, %v506_v47  ;;  %v520_v13 = vrot.slane %v518_v60, 5  ;;  %v528_v7 = vshll.u32 %v399_v59, 16  ;;  %v607_v8 = vrot.slane %v1945_v20, 5 }
  0x35   : > { %785 = vrot.lane.b32.xlu1 %v1484_v55, %s1715_s6  ;;  %v1964_v62 = vcombine.low %v497_v52, %v507_v14  ;;  %v601_v22 = vsel %vm1839_vm4, %v1471_v63, %v600_v49  ;;  %v604_v5 = vsel %vm1839_vm4, %v602_v2, %v603_v9  ;;  %v533_v18 = vshrl.u32 %v1969_v17, 16 }
  0x36   : > { %v525_v12 = vor.u32 %v524_v61, %v520_v13  ;;  %v536_v0 = vshll.u32 %v1969_v17, 16  ;;  %v516_v6 = vrot.slane %v515_v11, 4  ;;  %v1472_v25 = vrot.slane %v1936_v38, 9 }
  0x37   : > { %v610_v26 = vrot.slane %v399_v59, 5  ;;  %v530_v31 = vrot.slane %v528_v7, 5  ;;  %v609_v32 = vrot.slane %v607_v8, 4  ;;  %v546_v33 = vshrl.u32 %v1979_v19, 16  ;;  %v2048_v59 = vld [vmem:[%s1975_s12 + $0x10] sm:$0xf] }
  0x38   : > { %828 = vrot.lane.b32.xlu0 %v1484_v55, %s1716_s15  ;;  %v526_v30 = vrot.slane %v525_v12, 4  ;;  %v1999_v1 = vcombine.low %v601_v22, %v604_v5  ;;  %v2003_v3 = vcombine.low %v1936_v38, %v1945_v20  ;;  %v2009_v36 = vrot.slane %v533_v18, 4 }
  0x39   : > { %830 = vrot.lane.b32.xlu1 %v1964_v62, %s1716_s15  ;;  %v2011_v15 = vrot.slane %v536_v0, 5  ;;  %v542_v37 = vshll.u32 %v1979_v19, 16  ;;  %v620_v16 = vshrl.u32 %v1991_v28, 16  ;;  %v521_v39 = vsel %vm1882_vm5, %v516_v6, %v520_v13 }
  0x3a   : > { %v2019_v38 = vsel %vm1839_vm4, %v1472_v25, %v607_v8  ;;  %v623_v40 = vshll.u32 %v1991_v28, 16  ;;  %v633_v41 = vshrl.u32 %v1995_v34, 16  ;;  %v531_v43 = vsel %vm1882_vm5, %v526_v30, %v530_v31  ;;  %v408_v8 = vld [vmem:[%s1975_s12 + $0x14] sm:$0x1] }
  0x3b   : > { %v611_v44 = vsel %vm1839_vm4, %v609_v32, %v610_v26  ;;  %v2028_v20 = vrot.slane %v546_v33, 4  ;;  %v622_v45 = vrot.slane %v620_v16, 4  ;;  %v552_v46 = vshll.u32 %v2007_v35, 16 }
  0x3c   : > { %843 = vrot.lane.b32.xlu0 %v1902_v24, %s1717_s16  ;;  %v625_v47 = vrot.slane %v623_v40, 5  ;;  %v629_v48 = vshll.u32 %v1995_v34, 16  ;;  %v635_v49 = vrot.slane %v633_v41, 4  ;;  %v539_v51 = vor.u32 %v2011_v15, %v2009_v36 }
  0x3d   : > { %727 = vrot.lane.b32.xlu1 %v1484_v55, %s1714_s28  ;;  %v2041_v52 = vrot.slane %v542_v37, 5  ;;  %v639_v53 = vshll.u32 %v405_v42, 16  ;;  %v1474_v54 = vrot.slane %v1991_v28, 9  ;;  %v2044_v55 = vcombine.low %v521_v39, %v531_v43 }
  0x3e   : > { %v626_v56 = vor.u32 %v625_v47, %v622_v45  ;;  %v631_v57 = vrot.slane %v629_v48, 5  ;;  %v648_v14 = vrot.slane %v1995_v34, 5  ;;  %v651_v61 = vrot.slane %v405_v42, 5  ;;  %v1669_v47 = vld [vmem:[%s2278_s2 + $0x10] ss:$0 sps:$4 sm:$0x33]  }
  0x3f   : > { %v641_v60 = vrot.slane %v639_v53, 5  ;;  %v654_v63 = vshrl.u32 %v2035_v50, 16  ;;  %v657_v2 = vshll.u32 %v2035_v50, 16  ;;  %v549_v12 = vor.u32 %v2028_v20, %v2041_v52  ;;  %1604 = vmatprep.subr.msk.bf16.mxu0 %vm998_vm6, %v1669_v47  ;;  %1605 = vmatprep.subr.msk.bf16.mxu1 %vm998_vm6, %v1669_v47 }
  0x40   : > { %845 = vrot.lane.b32.xlu0 %v1999_v1, %s1717_s16  ;;  %v627_v9 = vrot.slane %v626_v56, 4  ;;  %v636_v11 = vor.u32 %v635_v49, %v631_v57  ;;  %v649_v13 = vsel %vm1839_vm4, %v1474_v54, %v648_v14  ;;  %v650_v7 = vrot.slane %v648_v14, 4 }
  0x41   : > { %729 = vrot.lane.b32.xlu1 %v1964_v62, %s1714_s28  ;;  %v667_v22 = vshrl.u32 %v2048_v59, 16  ;;  %v656_v5 = vrot.slane %v654_v63, 4  ;;  %v659_v18 = vrot.slane %v657_v2, 5  ;;  %v663_v25 = vshll.u32 %v2048_v59, 16 }
  0x42   : > { %v637_v0 = vrot.slane %v636_v11, 4  ;;  %v652_v6 = vsel %vm1839_vm4, %v650_v7, %v651_v61  ;;  %v673_v32 = vshll.u32 %v408_v8, 16  ;;  %v1475_v15 = vrot.slane %v2035_v50, 9 }
  0x43   : > { %v2067_v26 = vcombine.low %v649_v13, %v652_v6  ;;  %v660_v30 = vor.u32 %v659_v18, %v656_v5  ;;  %v669_v31 = vrot.slane %v667_v22, 4  ;;  %v665_v36 = vrot.slane %v663_v25, 5 }
  0x44   : > { %757 = vrot.lane.b32.xlu0 %v1902_v24, %s1713_s14  ;;  %v632_v24 = vsel %vm1882_vm5, %v627_v9, %v631_v57  ;;  %v642_v33 = vsel %vm1882_vm5, %v637_v0, %v641_v60  ;;  %v682_v37 = vrot.slane %v2048_v59, 5  ;;  %v675_v40 = vrot.slane %v673_v32, 5 }
  0x45   : > { %759 = vrot.lane.b32.xlu1 %v1999_v1, %s1713_s14  ;;  %v1495_v16 = vcombine.low %v632_v24, %v642_v33  ;;  %v661_v39 = vrot.slane %v660_v30, 4  ;;  %v685_v41 = vrot.slane %v408_v8, 5  ;;  %v670_v42 = vor.u32 %v669_v31, %v665_v36 }
  0x46   : > { %v683_v43 = vsel %vm1839_vm4, %v1475_v15, %v682_v37  ;;  %v684_v20 = vrot.slane %v682_v37, 4  ;;  %v1476_v45 = vcombine.low %v1846_v27, %v1850_v29  ;;  %v1492_v54 = vcombine.low %v2019_v38, %v611_v44 }
  0x47   : > { %v666_v48 = vsel %vm1882_vm5, %v661_v39, %v665_v36  ;;  %v671_v49 = vrot.slane %v670_v42, 4  ;;  %v554_v56 = vrot.slane %v552_v46, 5  ;;  %v540_v14 = vrot.slane %v539_v51, 4 }
  0x48   : > { %772 = vrot.lane.b32.xlu0 %v1834_v21, %s1710_s9  ;;  %v686_v53 = vsel %vm1839_vm4, %v684_v20, %v685_v41  ;;  %v550_v60 = vrot.slane %v549_v12, 4  ;;  %v1000_v63 = vsel %vm998_vm6, %v1669_v47, 0  ;;  %v2100_v38 = vcombine.low %v1969_v17, %v1979_v19 }
  0x49   : > { %774 = vrot.lane.b32.xlu1 %v2003_v3, %s1710_s9  ;;  %v1499_v57 = vcombine.low %v683_v43, %v686_v53  ;;  %v676_v61 = vsel %vm1882_vm5, %v671_v49, %v675_v40  ;;  %1585 = vmatpush3.bf16.msra.mxu0 %v1000_v63  ;;  %v614_v44 = vrot.slane %v1979_v19, 5  ;;  %v545_v46 = vsel %vm1882_vm5, %v540_v14, %v2041_v52 }
  0x4a   : > { %1603 = vmatpush3.bf16.msra.mxu1 %v1000_v63  ;;  %v555_v51 = vsel %vm1882_vm5, %v550_v60, %v554_v56  ;;  %v1473_v2 = vrot.slane %v1969_v17, 9  ;;  %v617_v11 = vrot.slane %v2007_v35, 5  ;;  %v1494_v17 = vcombine.low %v1991_v28, %v1995_v34 }
  0x4b   : > { %v616_v9 = vrot.slane %v614_v44, 4  ;;  %v1497_v23 = vcombine.low %v2035_v50, %v2048_v59 }
  0x4c   : > { %787 = vrot.lane.b32.xlu0 %v1964_v62, %s1715_s6  ;;  %v1498_v62 = vcombine.low %v666_v48, %v676_v61  ;;  %v615_v58 = vsel %vm1839_vm4, %v1473_v2, %v614_v44 }
  0x4d   : > { %789 = vrot.lane.b32.xlu1 %v2044_v55, %s1715_s6  ;;  %v618_v19 = vsel %vm1839_vm4, %v616_v9, %v617_v11 }
  0x4e   : > { %v1493_v52 = vcombine.low %v615_v58, %v618_v19 }
  0x50   : > { %802 = vrot.lane.b32.xlu0 %v1999_v1, %s1712_s13  ;;  %v1487_v1 = vcombine.low %v545_v46, %v555_v51 }
  0x51   : > { %804 = vrot.lane.b32.xlu1 %v1492_v54, %s1712_s13 }
  0x54   : > { %817 = vrot.lane.b32.xlu0 %v2003_v3, %s1711_s11 }
  0x55   : > { %819 = vrot.lane.b32.xlu1 %v2100_v38, %s1711_s11 }
  0x58   : > { %832 = vrot.lane.b32.xlu0 %v2044_v55, %s1716_s15 }
  0x59   : > { %834 = vrot.lane.b32.xlu1 %v1487_v1, %s1716_s15 }
  0x5c   : > { %847 = vrot.lane.b32.xlu0 %v1492_v54, %s1717_s16 }
  0x5d   : > { %731 = vrot.lane.b32.xlu1 %v2044_v55, %s1714_s28 }
  0x60   : > { %849 = vrot.lane.b32.xlu0 %v1493_v52, %s1717_s16 }
  0x61   : > { %733 = vrot.lane.b32.xlu1 %v1487_v1, %s1714_s28 }
  0x64   : > { %761 = vrot.lane.b32.xlu0 %v1492_v54, %s1713_s14 }
  0x65   : > { %763 = vrot.lane.b32.xlu1 %v1493_v52, %s1713_s14 }
  0x68   : > { %776 = vrot.lane.b32.xlu0 %v2100_v38, %s1710_s9 }
  0x69   : > { %778 = vrot.lane.b32.xlu1 %v1494_v17, %s1710_s9  ;;  %s1097_s9 = ssub.s32 16, %s1781_s25  ;;  %s2301_s25 = smov (!%p362_p8, %s1781_s25), 17 }
  0x6a   : > { %s1466_s14 = sshll.u32 %s2301_s25, 1 }
  0x6c   : > { %791 = vrot.lane.b32.xlu0 %v1487_v1, %s1715_s6 }
  0x6d   : > { %793 = vrot.lane.b32.xlu1 %v1495_v16, %s1715_s6  ;;  %s1610_s6 = smul.u32 3, %s2297_s19 }
  0x6f   : > { %s375_s26 = sadd.s32 %s1610_s6, %s2303_s18 }
  0x70   : > { %806 = vrot.lane.b32.xlu0 %v1493_v52, %s1712_s13  ;;  %s376_s12 = scalar_lea.vmem %s2280_s4, %s375_s26 }
  0x71   : > { %808 = vrot.lane.b32.xlu1 %v2067_v26, %s1712_s13  ;;  %s1609_s13 = smul.u32 36, %s2297_s19  ;;  %s383_s19 = scalar_lea.vmem %s2281_s5, %s375_s26 }
  0x73   : > { %s366_s27 = sadd.s32 %s1609_s13, %s1466_s14 }
  0x74   : > { %821 = vrot.lane.b32.xlu0 %v1494_v17, %s1711_s11  ;;  %s1467_s28 = sshll.u32 %s366_s27, 2 }
  0x75   : > { %823 = vrot.lane.b32.xlu1 %v1497_v23, %s1711_s11  ;;  %s1509_s11 = sshll.u32 %s1097_s9, 4  ;;  %s2228_s30 = scalar_lea.vmem %s2279_s3, %s1467_s28 }
  0x78   : > { %836 = vrot.lane.b32.xlu0 %v1495_v16, %s1716_s15 }
  0x79   : > { %838 = vrot.lane.b32.xlu1 %v1498_v62, %s1716_s15 }
  0x7c   : > { %851 = vrot.lane.b32.xlu0 %v2067_v26, %s1717_s16 }
  0x7d   : > { %853 = vrot.lane.b32.xlu1 %v1499_v57, %s1717_s16 }
  0x8e   : > { %v771_v28 = vpop.permute.xlu1 %770 }
  0x8f   : > { %v769_v34 = vpop.permute.xlu0 %768 }
  0x92   : > { %v816_v35 = vpop.permute.xlu1 %815 }
  0x93   : > { %v814_v55 = vpop.permute.xlu0 %813 }
  0x97   : > { %v799_v13 = vpop.permute.xlu0 %798 }
  0x99   : > { %v754_v7 = vpop.permute.xlu1 %753 }
  0x9d   : > { %v756_v50 = vpop.permute.xlu1 %755 }
  0x9e   : > { %v724_v59 = vpop.permute.xlu0 %723 }
  0x9f   : > { %v858_v8 = vsel %vm855_vm7, %v1476_v45, %v724_v59 }
  0xa0   : > { %v876_v5 = vsel %vm874_vm8, %v858_v8, %v754_v7 }
  0xa1   : > { %v801_v12 = vpop.permute.xlu1 %800  ;;  %v889_v6 = vsel %vm887_vm9, %v876_v5, %v769_v34 }
  0xa2   : > { %v726_v22 = vpop.permute.xlu0 %725 }
  0xa3   : > { %v861_v18 = vsel %vm855_vm7, %v1815_v10, %v726_v22 }
  0xa4   : > { %v878_v24 = vsel %vm874_vm8, %v861_v18, %v756_v50 }
  0xa5   : > { %v891_v0 = vsel %vm887_vm9, %v878_v24, %v771_v28 }
  0xa6   : > { %v784_v25 = vpop.permute.xlu0 %783 }
  0xa7   : > { %v786_v27 = vpop.permute.xlu1 %785  ;;  %v902_v29 = vsel %vm900_vm10, %v889_v6, %v784_v25 }
  0xa8   : > { %v915_v26 = vsel %vm913_vm11, %v902_v29, %v799_v13  ;;  %v904_v30 = vsel %vm900_vm10, %v891_v0, %v786_v27 }
  0xa9   : > { %v928_v32 = vsel %vm926_vm12, %v915_v26, %v814_v55  ;;  %v917_v33 = vsel %vm913_vm11, %v904_v30, %v801_v12 }
  0xaa   : > { %v829_v31 = vpop.permute.xlu0 %828  ;;  %v930_v37 = vsel %vm926_vm12, %v917_v33, %v816_v35 }
  0xab   : > { %v831_v10 = vpop.permute.xlu1 %830  ;;  %v941_v36 = vsel %vm939_vm13, %v928_v32, %v829_v31 }
  0xac   : > { %v943_v40 = vsel %vm939_vm13, %v930_v37, %v831_v10 }
  0xae   : > { %v844_v15 = vpop.permute.xlu0 %843 }
  0xaf   : > { %v728_v16 = vpop.permute.xlu1 %727  ;;  %v954_v39 = vsel %vm952_vm14, %v941_v36, %v844_v15 }
  0xb0   : > { %1586 = vmatprep.mubr.msk.bf16.mxu0 %vm985_vm15, %v954_v39  ;;  %v864_v60 = vsel %vm855_vm7, %v1805_v4, %v728_v16 }
  0xb2   : > { %v846_v41 = vpop.permute.xlu0 %845 }
  0xb3   : > { %v730_v42 = vpop.permute.xlu1 %729  ;;  %v956_v43 = vsel %vm952_vm14, %v943_v40, %v846_v41 }
  0xb4   : > { %1587 = vmatmul.mubr.msk.bf16.vlgmr.msra.gmra.mrb[0].mxu0 %vm985_vm15, %v956_v43  ;;  %v867_v51 = vsel %vm855_vm7, %v1834_v21, %v730_v42  ;;  %v1084_v42 = vlaneseq }
  0xb6   : > { %v758_v20 = vpop.permute.xlu0 %757  ;;  %v2212_v43 = vshrl.u32 %v1084_v42, 7 }
  0xb7   : > { %v760_v45 = vpop.permute.xlu1 %759  ;;  %v880_v61 = vsel %vm874_vm8, %v864_v60, %v758_v20 }
  0xb8   : > { %v882_v2 = vsel %vm874_vm8, %v867_v51, %v760_v45  ;;  %v1087_v20 = vadd.s32 16, %v2212_v43  ;;  %v2216_v45 = vstv %s1509_s11 }
  0xb9   : > { %vm1100_vm0 = vcmp.lt.s32.totalorder %v2212_v43, %v2216_v45 }
  0xba   : > { %v773_v47 = vpop.permute.xlu0 %772  ;;  %vm1102_vm1 = vcmp.lt.s32.totalorder %v1087_v20, %v2216_v45 }
  0xbb   : > { %v775_v48 = vpop.permute.xlu1 %774  ;;  %v893_v63 = vsel %vm887_vm9, %v880_v61, %v773_v47  ;;  %v1088_v47 = vadd.s32 24, %v2212_v43 }
  0xbc   : > { %v895_v11 = vsel %vm887_vm9, %v882_v2, %v775_v48  ;;  %v1086_v48 = vadd.s32 8, %v2212_v43 }
  0xbd   : > { %vm1103_vm2 = vcmp.lt.s32.totalorder %v1088_v47, %v2216_v45 }
  0xbe   : > { %v788_v49 = vpop.permute.xlu0 %787  ;;  %vm1101_vm3 = vcmp.lt.s32.totalorder %v1086_v48, %v2216_v45 }
  0xbf   : > { %v790_v53 = vpop.permute.xlu1 %789  ;;  %v906_v44 = vsel %vm900_vm10, %v893_v63, %v788_v49 }
  0xc0   : > { %v908_v19 = vsel %vm900_vm10, %v895_v11, %v790_v53 }
  0xc2   : > { %v803_v54 = vpop.permute.xlu0 %802 }
  0xc3   : > { %v805_v56 = vpop.permute.xlu1 %804  ;;  %v919_v1 = vsel %vm913_vm11, %v906_v44, %v803_v54 }
  0xc4   : > { %v921_v23 = vsel %vm913_vm11, %v908_v19, %v805_v56 }
  0xc6   : > { %v818_v57 = vpop.permute.xlu0 %817 }
  0xc7   : > { %v820_v14 = vpop.permute.xlu1 %819  ;;  %v932_v9 = vsel %vm926_vm12, %v919_v1, %v818_v57 }
  0xc8   : > { %v934_v21 = vsel %vm926_vm12, %v921_v23, %v820_v14  ;;  %v1092_v23 = vadd.s32 56, %v2212_v43 }
  0xca   : > { %v833_v62 = vpop.permute.xlu0 %832  ;;  %vm1107_vm6 = vcmp.lt.s32.totalorder %v1092_v23, %v2216_v45 }
  0xcb   : > { %v835_v46 = vpop.permute.xlu1 %834  ;;  %v945_v4 = vsel %vm939_vm13, %v932_v9, %v833_v62 }
  0xcc   : > { %v947_v28 = vsel %vm939_vm13, %v934_v21, %v835_v46  ;;  %v1090_v21 = vadd.s32 40, %v2212_v43 }
  0xce   : > { %v848_v58 = vpop.permute.xlu0 %847 }
  0xcf   : > { %v732_v52 = vpop.permute.xlu1 %731  ;;  %v958_v17 = vsel %vm952_vm14, %v945_v4, %v848_v58 }
  0xd0   : > { %1590 = vmatprep.mubr.msk.bf16.mxu1 %vm985_vm15, %v958_v17  ;;  %v870_v13 = vsel %vm855_vm7, %v2003_v3, %v732_v52  ;;  %v1089_v52 = vadd.s32 32, %v2212_v43  ;;  %v1091_v17 = vadd.s32 48, %v2212_v43 }
  0xd2   : > { %v850_v34 = vpop.permute.xlu0 %849  ;;  %vm1104_vm4 = vcmp.lt.s32.totalorder %v1089_v52, %v2216_v45  ;;  %vm1106_vm5 = vcmp.lt.s32.totalorder %v1091_v17, %v2216_v45 }
  0xd3   : > { %v734_v35 = vpop.permute.xlu1 %733  ;;  %v960_v55 = vsel %vm952_vm14, %v947_v28, %v850_v34 }
  0xd4   : > { %1591 = vmatmul.mubr.msk.bf16.vlgmr.msra.gmra.mrb[0].mxu1 %vm985_vm15, %v960_v55  ;;  %v873_v50 = vsel %vm855_vm7, %v2100_v38, %v734_v35  ;;  %vm1105_vm7 = vcmp.lt.s32.totalorder %v1090_v21, %v2216_v45 }
  0xd6   : > { %v762_v7 = vpop.permute.xlu0 %761 }
  0xd7   : > { %v764_v59 = vpop.permute.xlu1 %763  ;;  %v884_v8 = vsel %vm874_vm8, %v870_v13, %v762_v7 }
  0xd8   : > { %v886_v12 = vsel %vm874_vm8, %v873_v50, %v764_v59 }
  0xda   : > { %v777_v22 = vpop.permute.xlu0 %776 }
  0xdb   : > { %v779_v5 = vpop.permute.xlu1 %778  ;;  %v897_v18 = vsel %vm887_vm9, %v884_v8, %v777_v22 }
  0xdc   : > { %v899_v24 = vsel %vm887_vm9, %v886_v12, %v779_v5 }
  0xde   : > { %v792_v0 = vpop.permute.xlu0 %791 }
  0xdf   : > { %v794_v6 = vpop.permute.xlu1 %793  ;;  %v910_v25 = vsel %vm900_vm10, %v897_v18, %v792_v0 }
  0xe0   : > { %v912_v3 = vsel %vm900_vm10, %v899_v24, %v794_v6 }
  0xe2   : > { %v807_v27 = vpop.permute.xlu0 %806 }
  0xe3   : > { %v809_v29 = vpop.permute.xlu1 %808  ;;  %v923_v38 = vsel %vm913_vm11, %v910_v25, %v807_v27 }
  0xe4   : > { %v925_v26 = vsel %vm913_vm11, %v912_v3, %v809_v29 }
  0xe6   : > { %v822_v30 = vpop.permute.xlu0 %821 }
  0xe7   : > { %v824_v31 = vpop.permute.xlu1 %823  ;;  %v936_v10 = vsel %vm926_vm12, %v923_v38, %v822_v30  ;;  %v1093_v30 = vadd.s32 64, %v2212_v43 }
  0xe8   : > { %v938_v32 = vsel %vm926_vm12, %v925_v26, %v824_v31  ;;  %v1095_v31 = vadd.s32 80, %v2212_v43 }
  0xe9   : > { %vm1108_vm8 = vcmp.lt.s32.totalorder %v1093_v30, %v2216_v45 }
  0xea   : > { %v837_v33 = vpop.permute.xlu0 %836  ;;  %vm1110_vm9 = vcmp.lt.s32.totalorder %v1095_v31, %v2216_v45 }
  0xeb   : > { %v839_v36 = vpop.permute.xlu1 %838  ;;  %v949_v15 = vsel %vm939_vm13, %v936_v10, %v837_v33  ;;  %v1096_v10 = vadd.s32 88, %v2212_v43 }
  0xec   : > { %v951_v16 = vsel %vm939_vm13, %v938_v32, %v839_v36  ;;  %v1094_v32 = vadd.s32 72, %v2212_v43 }
  0xed   : > { %vm1111_vm10 = vcmp.lt.s32.totalorder %v1096_v10, %v2216_v45 }
  0xee   : > { %v852_v37 = vpop.permute.xlu0 %851  ;;  %vm1109_vm11 = vcmp.lt.s32.totalorder %v1094_v32, %v2216_v45 }
  0xef   : > { %v854_v39 = vpop.permute.xlu1 %853  ;;  %v962_v40 = vsel %vm952_vm14, %v949_v15, %v852_v37 }
  0xf0   : > { %v964_v41 = vsel %vm952_vm14, %v951_v16, %v854_v39  ;;  %1594 = vmatprep.mubr.msk.bf16.mxu1 %vm985_vm15, %v962_v40 }
  0xf1   : > { %1595 = vmatmul.mubr.msk.bf16.gmra.mrb[4].mxu1 %vm985_vm15, %v964_v41 }
 0x187   : > { %v1588_v49 = vpop.f32.mrb[0].mxu0 }
 0x188   : > { %v1036_v53 = vpop.f32.mrb[1].mxu0  ;;  %v1138_v57 = vsel %vm1102_vm1, %v1588_v49, 0.0 }
 0x189   : > { %v1136_v54 = vsel %vm1100_vm0, %v1036_v53, 0.0  ;;  %v1589_v56 = vpop.f32.mrb[2].mxu0  ;;  %v1168_v1 = vmul.f32 %v1138_v57, %v1138_v57 }
 0x18a   : > { %v1139_v14 = vsel %vm1103_vm2, %v1589_v56, 0.0  ;;  %v1039_v60 = vpop.f32.mrb[3].mxu0  ;;  %v1166_v62 = vmul.f32 %v1136_v54, %v1136_v54 }
 0x18b   : > { %v1544_v61 = vpack.c.bf16 %v1139_v14, %v1138_v57  ;;  %v1137_v63 = vsel %vm1101_vm3, %v1039_v60, 0.0  ;;  %v1169_v11 = vmul.f32 %v1139_v14, %v1139_v14 }
 0x18c   : > { %v1148_v44 = vadd.f32 %v1137_v63, %v1136_v54  ;;  %v1167_v46 = vmul.f32 %v1137_v63, %v1137_v63  ;;  %v1539_v51 = vpack.c.bf16 %v1137_v63, %v1136_v54 }
 0x18d   : > { %1566 = vst [vmem:[%s2228_s30 + $0x8] sm:$0xff] %v1544_v61  }
 0x18e   : > { %v1149_v2 = vadd.f32 %v1148_v44, %v1138_v57  ;;  %v1178_v9 = vadd.f32 %v1167_v46, %v1166_v62  ;;  %1540 = vst [vmem:[%s2228_s30] sm:$0xff] %v1539_v51  }
 0x190   : > { %v1179_v4 = vadd.f32 %v1178_v9, %v1168_v1  ;;  %v1150_v58 = vadd.f32 %v1149_v2, %v1139_v14 }
 0x192   : > { %v1180_v19 = vadd.f32 %v1179_v4, %v1169_v11 }
 0x1a7   : > { %v1592_v28 = vpop.f32.mrb[0].mxu1 }
 0x1a8   : > { %v1052_v34 = vpop.f32.mrb[1].mxu1  ;;  %v1142_v13 = vsel %vm1106_vm5, %v1592_v28, 0.0 }
 0x1a9   : > { %v1140_v35 = vsel %vm1104_vm4, %v1052_v34, 0.0  ;;  %v1593_v55 = vpop.f32.mrb[2].mxu1  ;;  %v1172_v6 = vmul.f32 %v1142_v13, %v1142_v13 }
 0x1aa   : > { %v1151_v7 = vadd.f32 %v1150_v58, %v1140_v35  ;;  %v1170_v50 = vmul.f32 %v1140_v35, %v1140_v35  ;;  %v1143_v59 = vsel %vm1107_vm6, %v1593_v55, 0.0  ;;  %v1055_v8 = vpop.f32.mrb[3].mxu1 }
 0x1ab   : > { %v1554_v12 = vpack.c.bf16 %v1143_v59, %v1142_v13  ;;  %v1141_v22 = vsel %vm1105_vm7, %v1055_v8, 0.0  ;;  %v1173_v27 = vmul.f32 %v1143_v59, %v1143_v59 }
 0x1ac   : > { %v1181_v5 = vadd.f32 %v1180_v19, %v1170_v50  ;;  %v1152_v18 = vadd.f32 %v1151_v7, %v1141_v22  ;;  %v1171_v24 = vmul.f32 %v1141_v22, %v1141_v22  ;;  %v1549_v0 = vpack.c.bf16 %v1141_v22, %v1140_v35 }
 0x1ad   : > { %1568 = vst [vmem:[%s2228_s30 + $0x18] sm:$0xff] %v1554_v12  }
 0x1ae   : > { %v1153_v25 = vadd.f32 %v1152_v18, %v1142_v13  ;;  %v1182_v3 = vadd.f32 %v1181_v5, %v1171_v24  ;;  %1567 = vst [vmem:[%s2228_s30 + $0x10] sm:$0xff] %v1549_v0  }
 0x1b0   : > { %v1183_v29 = vadd.f32 %v1182_v3, %v1172_v6  ;;  %v1154_v38 = vadd.f32 %v1153_v25, %v1143_v59 }
 0x1b2   : > { %v1184_v26 = vadd.f32 %v1183_v29, %v1173_v27 }
 0x1c4   : > { %v1596_v33 = vpop.f32.mrb[4].mxu1 }
 0x1c5   : > { %v1068_v36 = vpop.f32.mrb[5].mxu1  ;;  %v1146_v16 = vsel %vm1110_vm9, %v1596_v33, 0.0 }
 0x1c6   : > { %v1144_v15 = vsel %vm1108_vm8, %v1068_v36, 0.0  ;;  %v1597_v37 = vpop.f32.mrb[6].mxu1  ;;  %v1176_v54 = vmul.f32 %v1146_v16, %v1146_v16 }
 0x1c7   : > { %v1155_v39 = vadd.f32 %v1154_v38, %v1144_v15  ;;  %v1174_v40 = vmul.f32 %v1144_v15, %v1144_v15  ;;  %v1147_v41 = vsel %vm1111_vm10, %v1597_v37, 0.0  ;;  %v1071_v42 = vpop.f32.mrb[7].mxu1 }
 0x1c8   : > { %v1564_v43 = vpack.c.bf16 %v1147_v41, %v1146_v16  ;;  %v1145_v20 = vsel %vm1109_vm11, %v1071_v42, 0.0  ;;  %v1177_v57 = vmul.f32 %v1147_v41, %v1147_v41 }
 0x1c9   : > { %v1185_v47 = vadd.f32 %v1184_v26, %v1174_v40  ;;  %v1156_v48 = vadd.f32 %v1155_v39, %v1145_v20  ;;  %v1175_v49 = vmul.f32 %v1145_v20, %v1145_v20  ;;  %v1559_v53 = vpack.c.bf16 %v1145_v20, %v1144_v15 }
 0x1ca   : > { %1570 = vst [vmem:[%s2228_s30 + $0x28] sm:$0xff] %v1564_v43  }
 0x1cb   : > { %v1157_v45 = vadd.f32 %v1156_v48, %v1146_v16  ;;  %v1186_v56 = vadd.f32 %v1185_v47, %v1175_v49  ;;  %1569 = vst [vmem:[%s2228_s30 + $0x20] sm:$0xff] %v1559_v53  }
 0x1cd   : > { %v1158_v14 = vadd.f32 %v1157_v45, %v1147_v41  ;;  %v1187_v60 = vadd.f32 %v1186_v56, %v1176_v54 }
 0x1cf   : > { %v1159_v61 = vrot.slane %v1158_v14, 4  ;;  %v1188_v63 = vadd.f32 %v1187_v60, %v1177_v57 }
 0x1d1   : > { %v1160_v62 = vadd.f32 %v1159_v61, %v1158_v14  ;;  %v1189_v44 = vrot.slane %v1188_v63, 4 }
 0x1d3   : > { %v1161_v46 = vrot.slane %v1160_v62, 2  ;;  %v1190_v51 = vadd.f32 %v1189_v44, %v1188_v63 }
 0x1d5   : > { %v1162_v1 = vadd.f32 %v1161_v46, %v1160_v62  ;;  %v1191_v2 = vrot.slane %v1190_v51, 2 }
 0x1d7   : > { %v1163_v9 = vrot.slane %v1162_v1, 1  ;;  %v1192_v11 = vadd.f32 %v1191_v2, %v1190_v51 }
 0x1d9   : > { %v1164_v4 = vadd.f32 %v1163_v9, %v1162_v1  ;;  %v1193_v58 = vrot.slane %v1192_v11, 1 }
 0x1db   : > { %1165 = vst [vmem:[%s376_s12] sm:$0x1] %v1164_v4  ;;  %v1194_v19 = vadd.f32 %v1193_v58, %v1192_v11 }
 0x1dd   : > { %1195 = vst [vmem:[%s383_s19] sm:$0x1] %v1194_v19 }
 0x1de PF: > { %s16_s22 = sadd.s32 1, %s1708_s22   ;;  %s2286_s18 = smov %s1700_s20 }
 0x1df   : > { %p13_p10 = scmp.ge.s32.totalorder %s16_s22, 8   ;;  %s2287_s19 = smov %s1704_s21 }
 0x1e0   : > { %s2288_s20 = smov %s2291_s23  ;;  %s2289_s21 = smov %s2295_s24 }
 0x1e1   :  { %15 = sbr.rel (!%p13_p10) target bundleno = 3 (0x3), region = 89 }

</bundles_post_ra>
